<compile_context>
chip_gen: v6e
topology: v6e:2x2x1
jax: 0.10.0
libtpu: 0.0.40
codegen_flags: <defaults>
</compile_context>

<pallas_src>
import functools
import math

import jax
import jax.numpy as jnp
from jax.experimental import pallas as pl
from jax.experimental.pallas import tpu as pltpu


def _relpos_bias_kernel(table_t_ref, out_ref, *, j, tq, num_buckets, max_distance):
    """One grid step = one tile of `tq` consecutive query rows.

    table_t_ref: (heads, num_buckets) f32, VMEM-resident (constant index_map).
    out_ref:     (heads, tq * j) block of the flat (heads, i*j) output.
    """
    W = tq + j - 1                                   # window of distinct rel positions
    q_last = pl.program_id(0) * tq + (tq - 1)        # last query row of this tile

    # rel position covered by window lane w:  rel = w - q_last  (w = 0 .. W-1).
    w_iota = jax.lax.broadcasted_iota(jnp.int32, (1, W), 1)
    rel = w_iota - q_last

    # _relative_position_bucket (causal branch), exactly as in the PyTorch module.
    n = jnp.maximum(-rel, 0)
    max_exact = num_buckets // 2
    is_small = n < max_exact
    n_f = jnp.maximum(n.astype(jnp.float32), 1.0)    # guard log(0); masked by is_small
    val_if_large = max_exact + (
        jnp.log(n_f / max_exact)
        / math.log(max_distance / max_exact)
        * (num_buckets - max_exact)
    ).astype(jnp.int32)                              # trunc toward zero == torch .long()
    val_if_large = jnp.minimum(val_if_large, num_buckets - 1)
    bucket = jnp.where(is_small, n, val_if_large)    # (1, W) int32

    # Embedding gather over the tiny window only: (heads, NB) @ (NB, W) one-hot.
    b_iota = jax.lax.broadcasted_iota(jnp.int32, (num_buckets, W), 0)
    onehot = (b_iota == bucket).astype(jnp.float32)
    win = jnp.dot(table_t_ref[...], onehot,
                  preferred_element_type=jnp.float32)          # (heads, W) f32
    win = win.astype(out_ref.dtype)

    # Toeplitz expansion: query row r of the tile needs window lanes
    # [tq-1-r, tq-1-r+j).  All offsets are compile-time constants, so every store
    # is static (and fully lane-aligned / unmasked whenever j % 128 == 0).
    for r in range(tq):
        off = tq - 1 - r
        out_ref[:, r * j:(r + 1) * j] = win[:, off:off + j]


def _choose_tq(i, j, max_lanes, max_unroll=256):
    """Row-tile size: divisor of i, (tq*j) % 128 == 0 (lane-dense legal block),
    tq*j within the lane budget, bounded unroll, and >=4 (else >=2) grid steps
    when possible so both v7x TensorCores get work."""
    legal = [tq for tq in range(1, min(i, max_unroll) + 1)
             if i % tq == 0 and (tq * j) % 128 == 0]
    if not legal:
        return i                      # full-array block (tiny / odd shapes); always legal
    fit = [tq for tq in legal if tq * j <= max_lanes]
    if not fit:
        return min(legal)             # very long j: smallest legal tile (j not tiled)
    for min_steps in (4, 2, 1):
        pool = [tq for tq in fit if i // tq >= min_steps]
        if pool:
            return max(pool)
    return max(fit)


def rel_pos_bias(table, i, j, *, num_buckets=32, max_distance=128,
                 out_dtype=jnp.float32, max_block_lanes=None):
    """table: (num_buckets, heads) f32 (nn.Embedding weight).  Returns (heads, i, j)."""
    nb, heads = table.shape
    assert nb == num_buckets
    out_dtype = jnp.dtype(out_dtype)

    if max_block_lanes is None:
        # ~4 MiB output tile (8 MiB double-buffered) -> grid-step overhead << HBM
        # writeback, and comfortably inside every chip's scoped-VMEM default.
        max_block_lanes = max(128, (4 << 20) // (heads * out_dtype.itemsize))

    tq = _choose_tq(i, j, max_block_lanes)
    TB = tq * j
    W = tq + j - 1
    grid = (i // tq,)

    table_t = jnp.asarray(table, jnp.float32).T      # (heads, num_buckets); tiny, one-time

    # Explicit VMEM budget: double-buffered output tile + per-step window/one-hot
    # intermediates + margin (addresses v5e's 16 MiB scoped default explicitly).
    wpad = ((W + 127) // 128) * 128
    need = (2 * heads * TB * out_dtype.itemsize
            + 2 * (num_buckets + heads) * wpad * 4
            + (2 << 20))
    vmem_limit = int(min(max(need, 16 << 20), 64 << 20))

    out_flat = pl.pallas_call(
        functools.partial(_relpos_bias_kernel, j=j, tq=tq,
                          num_buckets=num_buckets, max_distance=max_distance),
        out_shape=jax.ShapeDtypeStruct((heads, i * j), out_dtype),
        grid=grid,
        in_specs=[
            # constant index_map -> table DMA'd once, stays VMEM-resident across tiles
            pl.BlockSpec((heads, num_buckets), lambda t: (0, 0)),
        ],
        out_specs=pl.BlockSpec((heads, TB), lambda t: (0, t)),
        compiler_params=pltpu.CompilerParams(
            dimension_semantics=("parallel",),       # row tiles split across v7x's 2 TCs
            vmem_limit_bytes=vmem_limit,
        ),
    )(table_t)

    # Contiguous split of the trailing dim only -- free, no transpose / extra HBM pass.
    return out_flat.reshape(heads, i, j)


def _reference(table, i, j, *, num_buckets=32, max_distance=128):
    """Pure-JAX reference reproducing the PyTorch forward."""
    q_pos = jnp.arange(i, dtype=jnp.int32)
    k_pos = jnp.arange(j, dtype=jnp.int32)
    rel_pos = k_pos[None, :] - q_pos[:, None]
    n = jnp.maximum(-rel_pos, 0)
    max_exact = num_buckets // 2
    is_small = n < max_exact
    n_f = jnp.maximum(n.astype(jnp.float32), 1.0)
    val_if_large = max_exact + (
        jnp.log(n_f / max_exact)
        / math.log(max_distance / max_exact)
        * (num_buckets - max_exact)
    ).astype(jnp.int32)
    val_if_large = jnp.minimum(val_if_large, num_buckets - 1)
    bucket = jnp.where(is_small, n, val_if_large)
    values = table[bucket]                    # (i, j, heads)
    return jnp.transpose(values, (2, 0, 1))   # (heads, i, j)


if __name__ == "__main__":
    heads, num_buckets, max_distance = 8, 32, 128
    key = jax.random.PRNGKey(0)
    # nn.Embedding(num_buckets, heads).weight ~ N(0, 1), deterministic init.
    table = jax.random.normal(key, (num_buckets, heads), dtype=jnp.float32)

    cases = [
        (256, 128, jnp.float32),   # multi-tile grid, aligned dense stores, log branch
        (8, 8, jnp.float32),       # tiny full-block fallback (tq == i, lanes < 128)
        (16, 24, jnp.float32),     # non-multiple-of-128 j (masked static stores)
        (64, 128, jnp.bfloat16),   # reduced-precision output path
    ]
    for (i, j, dt) in cases:
        out = rel_pos_bias(table, i, j, num_buckets=num_buckets,
                           max_distance=max_distance, out_dtype=dt)
        out = jax.block_until_ready(out)
        ref = _reference(table, i, j, num_buckets=num_buckets,
                         max_distance=max_distance)
        assert out.shape == (heads, i, j), (out.shape, i, j)
        if dt == jnp.float32:
            assert jnp.allclose(out, ref, atol=1e-6), \
                f"mismatch vs reference at (i={i}, j={j}, dtype={dt})"
        else:
            assert jnp.allclose(out.astype(jnp.float32), ref, atol=1e-2, rtol=1e-2), \
                f"mismatch vs reference at (i={i}, j={j}, dtype={dt})"

    print("KERNEL_OK")
</pallas_src>

<mosaic_0001>
module attributes {stable_mosaic.version = 11 : i64} {
  func.func @_relpos_bias_kernel(%arg0: i32, %arg1: memref<8x32xf32, #tpu.memory_space<vmem>>, %arg2: memref<8x8192xf32, #tpu.memory_space<vmem>>) attributes {dimension_semantics = [#tpu.dimension_semantics<parallel>], iteration_bounds = array<i64: 4>, scalar_prefetch = 0 : i64, scratch_operands = 0 : i64, tpu.core_type = #tpu.core_type<tc>, window_params = [{pipeline_mode = #tpu.pipeline_mode<synchronous>, transform_indices = @transform_0, window_bounds = array<i64: 8, 32>}, {transform_indices = @transform_1, window_bounds = array<i64: 8, 8192>}]} {
    %c64_i32 = arith.constant 64 : i32
    %0 = arith.muli %arg0, %c64_i32 : i32
    %c63_i32 = arith.constant 63 : i32
    %1 = arith.addi %0, %c63_i32 : i32
    %2 = tpu.iota {dimensions = array<i32: 1>} : vector<1x191xi32>
    %3 = vector.broadcast %1 : i32 to vector<1x191xi32>
    %4 = arith.subi %2, %3 : vector<1x191xi32>
    %c0_i32 = arith.constant 0 : i32
    %5 = vector.broadcast %c0_i32 : i32 to vector<1x191xi32>
    %6 = arith.subi %5, %4 : vector<1x191xi32>
    %c0_i32_0 = arith.constant 0 : i32
    %7 = vector.broadcast %c0_i32_0 : i32 to vector<1x191xi32>
    %8 = arith.maxsi %6, %7 : vector<1x191xi32>
    %c16_i32 = arith.constant 16 : i32
    %9 = vector.broadcast %c16_i32 : i32 to vector<1x191xi32>
    %10 = arith.cmpi slt, %8, %9 : vector<1x191xi32>
    %11 = arith.sitofp %8 : vector<1x191xi32> to vector<1x191xf32>
    %cst = arith.constant 1.000000e+00 : f32
    %12 = vector.broadcast %cst : f32 to vector<1x191xf32>
    %13 = arith.maximumf %11, %12 : vector<1x191xf32>
    %cst_1 = arith.constant 1.600000e+01 : f32
    %14 = vector.broadcast %cst_1 : f32 to vector<1x191xf32>
    %15 = arith.divf %13, %14 : vector<1x191xf32>
    %16 = math.log %15 : vector<1x191xf32>
    %cst_2 = arith.constant 2.07944155 : f32
    %17 = vector.broadcast %cst_2 : f32 to vector<1x191xf32>
    %18 = arith.divf %16, %17 : vector<1x191xf32>
    %cst_3 = arith.constant 1.600000e+01 : f32
    %19 = vector.broadcast %cst_3 : f32 to vector<1x191xf32>
    %20 = arith.mulf %18, %19 : vector<1x191xf32>
    %21 = arith.fptosi %20 : vector<1x191xf32> to vector<1x191xi32>
    %c16_i32_4 = arith.constant 16 : i32
    %22 = vector.broadcast %c16_i32_4 : i32 to vector<1x191xi32>
    %23 = arith.addi %22, %21 : vector<1x191xi32>
    %c31_i32 = arith.constant 31 : i32
    %24 = vector.broadcast %c31_i32 : i32 to vector<1x191xi32>
    %25 = arith.minsi %23, %24 : vector<1x191xi32>
    %26 = arith.select %10, %8, %25 : vector<1x191xi1>, vector<1x191xi32>
    %27 = tpu.iota {dimensions = array<i32: 0>} : vector<32x191xi32>
    %28 = vector.broadcast %26 : vector<1x191xi32> to vector<32x191xi32>
    %29 = arith.cmpi eq, %27, %28 : vector<32x191xi32>
    %30 = arith.extui %29 : vector<32x191xi1> to vector<32x191xi32>
    %31 = arith.sitofp %30 : vector<32x191xi32> to vector<32x191xf32>
    %c0 = arith.constant 0 : index
    %c0_5 = arith.constant 0 : index
    %32 = vector.load %arg1[%c0, %c0_5] : memref<8x32xf32, #tpu.memory_space<vmem>>, vector<8x32xf32>
    %cst_6 = arith.constant dense<0.000000e+00> : vector<8x191xf32>
    %33 = tpu.matmul %32, %31, %cst_6 {dimension_numbers = #tpu.dot_dimension_numbers<[1], [0], [0], [1], [0, 0, 1, 1], [], []>} : vector<8x32xf32>, vector<32x191xf32>, vector<8x191xf32> -> vector<8x191xf32>
    %34 = vector.extract_strided_slice %33 {offsets = [0, 63], sizes = [8, 128], strides = [1, 1]} : vector<8x191xf32> to vector<8x128xf32>
    %c0_7 = arith.constant 0 : index
    %c0_8 = arith.constant 0 : index
    %35 = vector.load %arg2[%c0_7, %c0_8] : memref<8x8192xf32, #tpu.memory_space<vmem>>, vector<8x128xf32>
    tpu.vector_store %arg2[%c0_7, %c0_8], %34 {strides = array<i32>} : memref<8x8192xf32, #tpu.memory_space<vmem>>, vector<8x128xf32>,
    %36 = vector.extract_strided_slice %33 {offsets = [0, 62], sizes = [8, 128], strides = [1, 1]} : vector<8x191xf32> to vector<8x128xf32>
    %c0_9 = arith.constant 0 : index
    %c128 = arith.constant 128 : index
    %37 = vector.load %arg2[%c0_9, %c128] : memref<8x8192xf32, #tpu.memory_space<vmem>>, vector<8x128xf32>
    tpu.vector_store %arg2[%c0_9, %c128], %36 {strides = array<i32>} : memref<8x8192xf32, #tpu.memory_space<vmem>>, vector<8x128xf32>,
    %38 = vector.extract_strided_slice %33 {offsets = [0, 61], sizes = [8, 128], strides = [1, 1]} : vector<8x191xf32> to vector<8x128xf32>
    %c0_10 = arith.constant 0 : index
    %c256 = arith.constant 256 : index
    %39 = vector.load %arg2[%c0_10, %c256] : memref<8x8192xf32, #tpu.memory_space<vmem>>, vector<8x128xf32>
    tpu.vector_store %arg2[%c0_10, %c256], %38 {strides = array<i32>} : memref<8x8192xf32, #tpu.memory_space<vmem>>, vector<8x128xf32>,
    %40 = vector.extract_strided_slice %33 {offsets = [0, 60], sizes = [8, 128], strides = [1, 1]} : vector<8x191xf32> to vector<8x128xf32>
    %c0_11 = arith.constant 0 : index
    %c384 = arith.constant 384 : index
    %41 = vector.load %arg2[%c0_11, %c384] : memref<8x8192xf32, #tpu.memory_space<vmem>>, vector<8x128xf32>
    tpu.vector_store %arg2[%c0_11, %c384], %40 {strides = array<i32>} : memref<8x8192xf32, #tpu.memory_space<vmem>>, vector<8x128xf32>,
    %42 = vector.extract_strided_slice %33 {offsets = [0, 59], sizes = [8, 128], strides = [1, 1]} : vector<8x191xf32> to vector<8x128xf32>
    %c0_12 = arith.constant 0 : index
    %c512 = arith.constant 512 : index
    %43 = vector.load %arg2[%c0_12, %c512] : memref<8x8192xf32, #tpu.memory_space<vmem>>, vector<8x128xf32>
    tpu.vector_store %arg2[%c0_12, %c512], %42 {strides = array<i32>} : memref<8x8192xf32, #tpu.memory_space<vmem>>, vector<8x128xf32>,
    %44 = vector.extract_strided_slice %33 {offsets = [0, 58], sizes = [8, 128], strides = [1, 1]} : vector<8x191xf32> to vector<8x128xf32>
    %c0_13 = arith.constant 0 : index
    %c640 = arith.constant 640 : index
    %45 = vector.load %arg2[%c0_13, %c640] : memref<8x8192xf32, #tpu.memory_space<vmem>>, vector<8x128xf32>
    tpu.vector_store %arg2[%c0_13, %c640], %44 {strides = array<i32>} : memref<8x8192xf32, #tpu.memory_space<vmem>>, vector<8x128xf32>,
    %46 = vector.extract_strided_slice %33 {offsets = [0, 57], sizes = [8, 128], strides = [1, 1]} : vector<8x191xf32> to vector<8x128xf32>
    %c0_14 = arith.constant 0 : index
    %c768 = arith.constant 768 : index
    %47 = vector.load %arg2[%c0_14, %c768] : memref<8x8192xf32, #tpu.memory_space<vmem>>, vector<8x128xf32>
    tpu.vector_store %arg2[%c0_14, %c768], %46 {strides = array<i32>} : memref<8x8192xf32, #tpu.memory_space<vmem>>, vector<8x128xf32>,
    %48 = vector.extract_strided_slice %33 {offsets = [0, 56], sizes = [8, 128], strides = [1, 1]} : vector<8x191xf32> to vector<8x128xf32>
    %c0_15 = arith.constant 0 : index
    %c896 = arith.constant 896 : index
    %49 = vector.load %arg2[%c0_15, %c896] : memref<8x8192xf32, #tpu.memory_space<vmem>>, vector<8x128xf32>
    tpu.vector_store %arg2[%c0_15, %c896], %48 {strides = array<i32>} : memref<8x8192xf32, #tpu.memory_space<vmem>>, vector<8x128xf32>,
    %50 = vector.extract_strided_slice %33 {offsets = [0, 55], sizes = [8, 128], strides = [1, 1]} : vector<8x191xf32> to vector<8x128xf32>
    %c0_16 = arith.constant 0 : index
    %c1024 = arith.constant 1024 : index
    %51 = vector.load %arg2[%c0_16, %c1024] : memref<8x8192xf32, #tpu.memory_space<vmem>>, vector<8x128xf32>
    tpu.vector_store %arg2[%c0_16, %c1024], %50 {strides = array<i32>} : memref<8x8192xf32, #tpu.memory_space<vmem>>, vector<8x128xf32>,
    %52 = vector.extract_strided_slice %33 {offsets = [0, 54], sizes = [8, 128], strides = [1, 1]} : vector<8x191xf32> to vector<8x128xf32>
    %c0_17 = arith.constant 0 : index
    %c1152 = arith.constant 1152 : index
    %53 = vector.load %arg2[%c0_17, %c1152] : memref<8x8192xf32, #tpu.memory_space<vmem>>, vector<8x128xf32>
    tpu.vector_store %arg2[%c0_17, %c1152], %52 {strides = array<i32>} : memref<8x8192xf32, #tpu.memory_space<vmem>>, vector<8x128xf32>,
    %54 = vector.extract_strided_slice %33 {offsets = [0, 53], sizes = [8, 128], strides = [1, 1]} : vector<8x191xf32> to vector<8x128xf32>
    %c0_18 = arith.constant 0 : index
    %c1280 = arith.constant 1280 : index
    %55 = vector.load %arg2[%c0_18, %c1280] : memref<8x8192xf32, #tpu.memory_space<vmem>>, vector<8x128xf32>
    tpu.vector_store %arg2[%c0_18, %c1280], %54 {strides = array<i32>} : memref<8x8192xf32, #tpu.memory_space<vmem>>, vector<8x128xf32>,
    %56 = vector.extract_strided_slice %33 {offsets = [0, 52], sizes = [8, 128], strides = [1, 1]} : vector<8x191xf32> to vector<8x128xf32>
    %c0_19 = arith.constant 0 : index
    %c1408 = arith.constant 1408 : index
    %57 = vector.load %arg2[%c0_19, %c1408] : memref<8x8192xf32, #tpu.memory_space<vmem>>, vector<8x128xf32>
    tpu.vector_store %arg2[%c0_19, %c1408], %56 {strides = array<i32>} : memref<8x8192xf32, #tpu.memory_space<vmem>>, vector<8x128xf32>,
    %58 = vector.extract_strided_slice %33 {offsets = [0, 51], sizes = [8, 128], strides = [1, 1]} : vector<8x191xf32> to vector<8x128xf32>
    %c0_20 = arith.constant 0 : index
    %c1536 = arith.constant 1536 : index
    %59 = vector.load %arg2[%c0_20, %c1536] : memref<8x8192xf32, #tpu.memory_space<vmem>>, vector<8x128xf32>
    tpu.vector_store %arg2[%c0_20, %c1536], %58 {strides = array<i32>} : memref<8x8192xf32, #tpu.memory_space<vmem>>, vector<8x128xf32>,
    %60 = vector.extract_strided_slice %33 {offsets = [0, 50], sizes = [8, 128], strides = [1, 1]} : vector<8x191xf32> to vector<8x128xf32>
    %c0_21 = arith.constant 0 : index
    %c1664 = arith.constant 1664 : index
    %61 = vector.load %arg2[%c0_21, %c1664] : memref<8x8192xf32, #tpu.memory_space<vmem>>, vector<8x128xf32>
    tpu.vector_store %arg2[%c0_21, %c1664], %60 {strides = array<i32>} : memref<8x8192xf32, #tpu.memory_space<vmem>>, vector<8x128xf32>,
    %62 = vector.extract_strided_slice %33 {offsets = [0, 49], sizes = [8, 128], strides = [1, 1]} : vector<8x191xf32> to vector<8x128xf32>
    %c0_22 = arith.constant 0 : index
    %c1792 = arith.constant 1792 : index
    %63 = vector.load %arg2[%c0_22, %c1792] : memref<8x8192xf32, #tpu.memory_space<vmem>>, vector<8x128xf32>
    tpu.vector_store %arg2[%c0_22, %c1792], %62 {strides = array<i32>} : memref<8x8192xf32, #tpu.memory_space<vmem>>, vector<8x128xf32>,
    %64 = vector.extract_strided_slice %33 {offsets = [0, 48], sizes = [8, 128], strides = [1, 1]} : vector<8x191xf32> to vector<8x128xf32>
    %c0_23 = arith.constant 0 : index
    %c1920 = arith.constant 1920 : index
    %65 = vector.load %arg2[%c0_23, %c1920] : memref<8x8192xf32, #tpu.memory_space<vmem>>, vector<8x128xf32>
    tpu.vector_store %arg2[%c0_23, %c1920], %64 {strides = array<i32>} : memref<8x8192xf32, #tpu.memory_space<vmem>>, vector<8x128xf32>,
    %66 = vector.extract_strided_slice %33 {offsets = [0, 47], sizes = [8, 128], strides = [1, 1]} : vector<8x191xf32> to vector<8x128xf32>
    %c0_24 = arith.constant 0 : index
    %c2048 = arith.constant 2048 : index
    %67 = vector.load %arg2[%c0_24, %c2048] : memref<8x8192xf32, #tpu.memory_space<vmem>>, vector<8x128xf32>
    tpu.vector_store %arg2[%c0_24, %c2048], %66 {strides = array<i32>} : memref<8x8192xf32, #tpu.memory_space<vmem>>, vector<8x128xf32>,
    %68 = vector.extract_strided_slice %33 {offsets = [0, 46], sizes = [8, 128], strides = [1, 1]} : vector<8x191xf32> to vector<8x128xf32>
    %c0_25 = arith.constant 0 : index
    %c2176 = arith.constant 2176 : index
    %69 = vector.load %arg2[%c0_25, %c2176] : memref<8x8192xf32, #tpu.memory_space<vmem>>, vector<8x128xf32>
    tpu.vector_store %arg2[%c0_25, %c2176], %68 {strides = array<i32>} : memref<8x8192xf32, #tpu.memory_space<vmem>>, vector<8x128xf32>,
    %70 = vector.extract_strided_slice %33 {offsets = [0, 45], sizes = [8, 128], strides = [1, 1]} : vector<8x191xf32> to vector<8x128xf32>
    %c0_26 = arith.constant 0 : index
    %c2304 = arith.constant 2304 : index
    %71 = vector.load %arg2[%c0_26, %c2304] : memref<8x8192xf32, #tpu.memory_space<vmem>>, vector<8x128xf32>
    tpu.vector_store %arg2[%c0_26, %c2304], %70 {strides = array<i32>} : memref<8x8192xf32, #tpu.memory_space<vmem>>, vector<8x128xf32>,
    %72 = vector.extract_strided_slice %33 {offsets = [0, 44], sizes = [8, 128], strides = [1, 1]} : vector<8x191xf32> to vector<8x128xf32>
    %c0_27 = arith.constant 0 : index
    %c2432 = arith.constant 2432 : index
    %73 = vector.load %arg2[%c0_27, %c2432] : memref<8x8192xf32, #tpu.memory_space<vmem>>, vector<8x128xf32>
    tpu.vector_store %arg2[%c0_27, %c2432], %72 {strides = array<i32>} : memref<8x8192xf32, #tpu.memory_space<vmem>>, vector<8x128xf32>,
    %74 = vector.extract_strided_slice %33 {offsets = [0, 43], sizes = [8, 128], strides = [1, 1]} : vector<8x191xf32> to vector<8x128xf32>
    %c0_28 = arith.constant 0 : index
    %c2560 = arith.constant 2560 : index
    %75 = vector.load %arg2[%c0_28, %c2560] : memref<8x8192xf32, #tpu.memory_space<vmem>>, vector<8x128xf32>
    tpu.vector_store %arg2[%c0_28, %c2560], %74 {strides = array<i32>} : memref<8x8192xf32, #tpu.memory_space<vmem>>, vector<8x128xf32>,
    %76 = vector.extract_strided_slice %33 {offsets = [0, 42], sizes = [8, 128], strides = [1, 1]} : vector<8x191xf32> to vector<8x128xf32>
    %c0_29 = arith.constant 0 : index
    %c2688 = arith.constant 2688 : index
    %77 = vector.load %arg2[%c0_29, %c2688] : memref<8x8192xf32, #tpu.memory_space<vmem>>, vector<8x128xf32>
    tpu.vector_store %arg2[%c0_29, %c2688], %76 {strides = array<i32>} : memref<8x8192xf32, #tpu.memory_space<vmem>>, vector<8x128xf32>,
    %78 = vector.extract_strided_slice %33 {offsets = [0, 41], sizes = [8, 128], strides = [1, 1]} : vector<8x191xf32> to vector<8x128xf32>
    %c0_30 = arith.constant 0 : index
    %c2816 = arith.constant 2816 : index
    %79 = vector.load %arg2[%c0_30, %c2816] : memref<8x8192xf32, #tpu.memory_space<vmem>>, vector<8x128xf32>
    tpu.vector_store %arg2[%c0_30, %c2816], %78 {strides = array<i32>} : memref<8x8192xf32, #tpu.memory_space<vmem>>, vector<8x128xf32>,
    %80 = vector.extract_strided_slice %33 {offsets = [0, 40], sizes = [8, 128], strides = [1, 1]} : vector<8x191xf32> to vector<8x128xf32>
    %c0_31 = arith.constant 0 : index
    %c2944 = arith.constant 2944 : index
    %81 = vector.load %arg2[%c0_31, %c2944] : memref<8x8192xf32, #tpu.memory_space<vmem>>, vector<8x128xf32>
    tpu.vector_store %arg2[%c0_31, %c2944], %80 {strides = array<i32>} : memref<8x8192xf32, #tpu.memory_space<vmem>>, vector<8x128xf32>,
    %82 = vector.extract_strided_slice %33 {offsets = [0, 39], sizes = [8, 128], strides = [1, 1]} : vector<8x191xf32> to vector<8x128xf32>
    %c0_32 = arith.constant 0 : index
    %c3072 = arith.constant 3072 : index
    %83 = vector.load %arg2[%c0_32, %c3072] : memref<8x8192xf32, #tpu.memory_space<vmem>>, vector<8x128xf32>
    tpu.vector_store %arg2[%c0_32, %c3072], %82 {strides = array<i32>} : memref<8x8192xf32, #tpu.memory_space<vmem>>, vector<8x128xf32>,
    %84 = vector.extract_strided_slice %33 {offsets = [0, 38], sizes = [8, 128], strides = [1, 1]} : vector<8x191xf32> to vector<8x128xf32>
    %c0_33 = arith.constant 0 : index
    %c3200 = arith.constant 3200 : index
    %85 = vector.load %arg2[%c0_33, %c3200] : memref<8x8192xf32, #tpu.memory_space<vmem>>, vector<8x128xf32>
    tpu.vector_store %arg2[%c0_33, %c3200], %84 {strides = array<i32>} : memref<8x8192xf32, #tpu.memory_space<vmem>>, vector<8x128xf32>,
    %86 = vector.extract_strided_slice %33 {offsets = [0, 37], sizes = [8, 128], strides = [1, 1]} : vector<8x191xf32> to vector<8x128xf32>
    %c0_34 = arith.constant 0 : index
    %c3328 = arith.constant 3328 : index
    %87 = vector.load %arg2[%c0_34, %c3328] : memref<8x8192xf32, #tpu.memory_space<vmem>>, vector<8x128xf32>
    tpu.vector_store %arg2[%c0_34, %c3328], %86 {strides = array<i32>} : memref<8x8192xf32, #tpu.memory_space<vmem>>, vector<8x128xf32>,
    %88 = vector.extract_strided_slice %33 {offsets = [0, 36], sizes = [8, 128], strides = [1, 1]} : vector<8x191xf32> to vector<8x128xf32>
    %c0_35 = arith.constant 0 : index
    %c3456 = arith.constant 3456 : index
    %89 = vector.load %arg2[%c0_35, %c3456] : memref<8x8192xf32, #tpu.memory_space<vmem>>, vector<8x128xf32>
    tpu.vector_store %arg2[%c0_35, %c3456], %88 {strides = array<i32>} : memref<8x8192xf32, #tpu.memory_space<vmem>>, vector<8x128xf32>,
    %90 = vector.extract_strided_slice %33 {offsets = [0, 35], sizes = [8, 128], strides = [1, 1]} : vector<8x191xf32> to vector<8x128xf32>
    %c0_36 = arith.constant 0 : index
    %c3584 = arith.constant 3584 : index
    %91 = vector.load %arg2[%c0_36, %c3584] : memref<8x8192xf32, #tpu.memory_space<vmem>>, vector<8x128xf32>
    tpu.vector_store %arg2[%c0_36, %c3584], %90 {strides = array<i32>} : memref<8x8192xf32, #tpu.memory_space<vmem>>, vector<8x128xf32>,
    %92 = vector.extract_strided_slice %33 {offsets = [0, 34], sizes = [8, 128], strides = [1, 1]} : vector<8x191xf32> to vector<8x128xf32>
    %c0_37 = arith.constant 0 : index
    %c3712 = arith.constant 3712 : index
    %93 = vector.load %arg2[%c0_37, %c3712] : memref<8x8192xf32, #tpu.memory_space<vmem>>, vector<8x128xf32>
    tpu.vector_store %arg2[%c0_37, %c3712], %92 {strides = array<i32>} : memref<8x8192xf32, #tpu.memory_space<vmem>>, vector<8x128xf32>,
    %94 = vector.extract_strided_slice %33 {offsets = [0, 33], sizes = [8, 128], strides = [1, 1]} : vector<8x191xf32> to vector<8x128xf32>
    %c0_38 = arith.constant 0 : index
    %c3840 = arith.constant 3840 : index
    %95 = vector.load %arg2[%c0_38, %c3840] : memref<8x8192xf32, #tpu.memory_space<vmem>>, vector<8x128xf32>
    tpu.vector_store %arg2[%c0_38, %c3840], %94 {strides = array<i32>} : memref<8x8192xf32, #tpu.memory_space<vmem>>, vector<8x128xf32>,
    %96 = vector.extract_strided_slice %33 {offsets = [0, 32], sizes = [8, 128], strides = [1, 1]} : vector<8x191xf32> to vector<8x128xf32>
    %c0_39 = arith.constant 0 : index
    %c3968 = arith.constant 3968 : index
    %97 = vector.load %arg2[%c0_39, %c3968] : memref<8x8192xf32, #tpu.memory_space<vmem>>, vector<8x128xf32>
    tpu.vector_store %arg2[%c0_39, %c3968], %96 {strides = array<i32>} : memref<8x8192xf32, #tpu.memory_space<vmem>>, vector<8x128xf32>,
    %98 = vector.extract_strided_slice %33 {offsets = [0, 31], sizes = [8, 128], strides = [1, 1]} : vector<8x191xf32> to vector<8x128xf32>
    %c0_40 = arith.constant 0 : index
    %c4096 = arith.constant 4096 : index
    %99 = vector.load %arg2[%c0_40, %c4096] : memref<8x8192xf32, #tpu.memory_space<vmem>>, vector<8x128xf32>
    tpu.vector_store %arg2[%c0_40, %c4096], %98 {strides = array<i32>} : memref<8x8192xf32, #tpu.memory_space<vmem>>, vector<8x128xf32>,
    %100 = vector.extract_strided_slice %33 {offsets = [0, 30], sizes = [8, 128], strides = [1, 1]} : vector<8x191xf32> to vector<8x128xf32>
    %c0_41 = arith.constant 0 : index
    %c4224 = arith.constant 4224 : index
    %101 = vector.load %arg2[%c0_41, %c4224] : memref<8x8192xf32, #tpu.memory_space<vmem>>, vector<8x128xf32>
    tpu.vector_store %arg2[%c0_41, %c4224], %100 {strides = array<i32>} : memref<8x8192xf32, #tpu.memory_space<vmem>>, vector<8x128xf32>,
    %102 = vector.extract_strided_slice %33 {offsets = [0, 29], sizes = [8, 128], strides = [1, 1]} : vector<8x191xf32> to vector<8x128xf32>
    %c0_42 = arith.constant 0 : index
    %c4352 = arith.constant 4352 : index
    %103 = vector.load %arg2[%c0_42, %c4352] : memref<8x8192xf32, #tpu.memory_space<vmem>>, vector<8x128xf32>
    tpu.vector_store %arg2[%c0_42, %c4352], %102 {strides = array<i32>} : memref<8x8192xf32, #tpu.memory_space<vmem>>, vector<8x128xf32>,
    %104 = vector.extract_strided_slice %33 {offsets = [0, 28], sizes = [8, 128], strides = [1, 1]} : vector<8x191xf32> to vector<8x128xf32>
    %c0_43 = arith.constant 0 : index
    %c4480 = arith.constant 4480 : index
    %105 = vector.load %arg2[%c0_43, %c4480] : memref<8x8192xf32, #tpu.memory_space<vmem>>, vector<8x128xf32>
    tpu.vector_store %arg2[%c0_43, %c4480], %104 {strides = array<i32>} : memref<8x8192xf32, #tpu.memory_space<vmem>>, vector<8x128xf32>,
    %106 = vector.extract_strided_slice %33 {offsets = [0, 27], sizes = [8, 128], strides = [1, 1]} : vector<8x191xf32> to vector<8x128xf32>
    %c0_44 = arith.constant 0 : index
    %c4608 = arith.constant 4608 : index
    %107 = vector.load %arg2[%c0_44, %c4608] : memref<8x8192xf32, #tpu.memory_space<vmem>>, vector<8x128xf32>
    tpu.vector_store %arg2[%c0_44, %c4608], %106 {strides = array<i32>} : memref<8x8192xf32, #tpu.memory_space<vmem>>, vector<8x128xf32>,
    %108 = vector.extract_strided_slice %33 {offsets = [0, 26], sizes = [8, 128], strides = [1, 1]} : vector<8x191xf32> to vector<8x128xf32>
    %c0_45 = arith.constant 0 : index
    %c4736 = arith.constant 4736 : index
    %109 = vector.load %arg2[%c0_45, %c4736] : memref<8x8192xf32, #tpu.memory_space<vmem>>, vector<8x128xf32>
    tpu.vector_store %arg2[%c0_45, %c4736], %108 {strides = array<i32>} : memref<8x8192xf32, #tpu.memory_space<vmem>>, vector<8x128xf32>,
    %110 = vector.extract_strided_slice %33 {offsets = [0, 25], sizes = [8, 128], strides = [1, 1]} : vector<8x191xf32> to vector<8x128xf32>
    %c0_46 = arith.constant 0 : index
    %c4864 = arith.constant 4864 : index
    %111 = vector.load %arg2[%c0_46, %c4864] : memref<8x8192xf32, #tpu.memory_space<vmem>>, vector<8x128xf32>
    tpu.vector_store %arg2[%c0_46, %c4864], %110 {strides = array<i32>} : memref<8x8192xf32, #tpu.memory_space<vmem>>, vector<8x128xf32>,
    %112 = vector.extract_strided_slice %33 {offsets = [0, 24], sizes = [8, 128], strides = [1, 1]} : vector<8x191xf32> to vector<8x128xf32>
    %c0_47 = arith.constant 0 : index
    %c4992 = arith.constant 4992 : index
    %113 = vector.load %arg2[%c0_47, %c4992] : memref<8x8192xf32, #tpu.memory_space<vmem>>, vector<8x128xf32>
    tpu.vector_store %arg2[%c0_47, %c4992], %112 {strides = array<i32>} : memref<8x8192xf32, #tpu.memory_space<vmem>>, vector<8x128xf32>,
    %114 = vector.extract_strided_slice %33 {offsets = [0, 23], sizes = [8, 128], strides = [1, 1]} : vector<8x191xf32> to vector<8x128xf32>
    %c0_48 = arith.constant 0 : index
    %c5120 = arith.constant 5120 : index
    %115 = vector.load %arg2[%c0_48, %c5120] : memref<8x8192xf32, #tpu.memory_space<vmem>>, vector<8x128xf32>
    tpu.vector_store %arg2[%c0_48, %c5120], %114 {strides = array<i32>} : memref<8x8192xf32, #tpu.memory_space<vmem>>, vector<8x128xf32>,
    %116 = vector.extract_strided_slice %33 {offsets = [0, 22], sizes = [8, 128], strides = [1, 1]} : vector<8x191xf32> to vector<8x128xf32>
    %c0_49 = arith.constant 0 : index
    %c5248 = arith.constant 5248 : index
    %117 = vector.load %arg2[%c0_49, %c5248] : memref<8x8192xf32, #tpu.memory_space<vmem>>, vector<8x128xf32>
    tpu.vector_store %arg2[%c0_49, %c5248], %116 {strides = array<i32>} : memref<8x8192xf32, #tpu.memory_space<vmem>>, vector<8x128xf32>,
    %118 = vector.extract_strided_slice %33 {offsets = [0, 21], sizes = [8, 128], strides = [1, 1]} : vector<8x191xf32> to vector<8x128xf32>
    %c0_50 = arith.constant 0 : index
    %c5376 = arith.constant 5376 : index
    %119 = vector.load %arg2[%c0_50, %c5376] : memref<8x8192xf32, #tpu.memory_space<vmem>>, vector<8x128xf32>
    tpu.vector_store %arg2[%c0_50, %c5376], %118 {strides = array<i32>} : memref<8x8192xf32, #tpu.memory_space<vmem>>, vector<8x128xf32>,
    %120 = vector.extract_strided_slice %33 {offsets = [0, 20], sizes = [8, 128], strides = [1, 1]} : vector<8x191xf32> to vector<8x128xf32>
    %c0_51 = arith.constant 0 : index
    %c5504 = arith.constant 5504 : index
    %121 = vector.load %arg2[%c0_51, %c5504] : memref<8x8192xf32, #tpu.memory_space<vmem>>, vector<8x128xf32>
    tpu.vector_store %arg2[%c0_51, %c5504], %120 {strides = array<i32>} : memref<8x8192xf32, #tpu.memory_space<vmem>>, vector<8x128xf32>,
    %122 = vector.extract_strided_slice %33 {offsets = [0, 19], sizes = [8, 128], strides = [1, 1]} : vector<8x191xf32> to vector<8x128xf32>
    %c0_52 = arith.constant 0 : index
    %c5632 = arith.constant 5632 : index
    %123 = vector.load %arg2[%c0_52, %c5632] : memref<8x8192xf32, #tpu.memory_space<vmem>>, vector<8x128xf32>
    tpu.vector_store %arg2[%c0_52, %c5632], %122 {strides = array<i32>} : memref<8x8192xf32, #tpu.memory_space<vmem>>, vector<8x128xf32>,
    %124 = vector.extract_strided_slice %33 {offsets = [0, 18], sizes = [8, 128], strides = [1, 1]} : vector<8x191xf32> to vector<8x128xf32>
    %c0_53 = arith.constant 0 : index
    %c5760 = arith.constant 5760 : index
    %125 = vector.load %arg2[%c0_53, %c5760] : memref<8x8192xf32, #tpu.memory_space<vmem>>, vector<8x128xf32>
    tpu.vector_store %arg2[%c0_53, %c5760], %124 {strides = array<i32>} : memref<8x8192xf32, #tpu.memory_space<vmem>>, vector<8x128xf32>,
    %126 = vector.extract_strided_slice %33 {offsets = [0, 17], sizes = [8, 128], strides = [1, 1]} : vector<8x191xf32> to vector<8x128xf32>
    %c0_54 = arith.constant 0 : index
    %c5888 = arith.constant 5888 : index
    %127 = vector.load %arg2[%c0_54, %c5888] : memref<8x8192xf32, #tpu.memory_space<vmem>>, vector<8x128xf32>
    tpu.vector_store %arg2[%c0_54, %c5888], %126 {strides = array<i32>} : memref<8x8192xf32, #tpu.memory_space<vmem>>, vector<8x128xf32>,
    %128 = vector.extract_strided_slice %33 {offsets = [0, 16], sizes = [8, 128], strides = [1, 1]} : vector<8x191xf32> to vector<8x128xf32>
    %c0_55 = arith.constant 0 : index
    %c6016 = arith.constant 6016 : index
    %129 = vector.load %arg2[%c0_55, %c6016] : memref<8x8192xf32, #tpu.memory_space<vmem>>, vector<8x128xf32>
    tpu.vector_store %arg2[%c0_55, %c6016], %128 {strides = array<i32>} : memref<8x8192xf32, #tpu.memory_space<vmem>>, vector<8x128xf32>,
    %130 = vector.extract_strided_slice %33 {offsets = [0, 15], sizes = [8, 128], strides = [1, 1]} : vector<8x191xf32> to vector<8x128xf32>
    %c0_56 = arith.constant 0 : index
    %c6144 = arith.constant 6144 : index
    %131 = vector.load %arg2[%c0_56, %c6144] : memref<8x8192xf32, #tpu.memory_space<vmem>>, vector<8x128xf32>
    tpu.vector_store %arg2[%c0_56, %c6144], %130 {strides = array<i32>} : memref<8x8192xf32, #tpu.memory_space<vmem>>, vector<8x128xf32>,
    %132 = vector.extract_strided_slice %33 {offsets = [0, 14], sizes = [8, 128], strides = [1, 1]} : vector<8x191xf32> to vector<8x128xf32>
    %c0_57 = arith.constant 0 : index
    %c6272 = arith.constant 6272 : index
    %133 = vector.load %arg2[%c0_57, %c6272] : memref<8x8192xf32, #tpu.memory_space<vmem>>, vector<8x128xf32>
    tpu.vector_store %arg2[%c0_57, %c6272], %132 {strides = array<i32>} : memref<8x8192xf32, #tpu.memory_space<vmem>>, vector<8x128xf32>,
    %134 = vector.extract_strided_slice %33 {offsets = [0, 13], sizes = [8, 128], strides = [1, 1]} : vector<8x191xf32> to vector<8x128xf32>
    %c0_58 = arith.constant 0 : index
    %c6400 = arith.constant 6400 : index
    %135 = vector.load %arg2[%c0_58, %c6400] : memref<8x8192xf32, #tpu.memory_space<vmem>>, vector<8x128xf32>
    tpu.vector_store %arg2[%c0_58, %c6400], %134 {strides = array<i32>} : memref<8x8192xf32, #tpu.memory_space<vmem>>, vector<8x128xf32>,
    %136 = vector.extract_strided_slice %33 {offsets = [0, 12], sizes = [8, 128], strides = [1, 1]} : vector<8x191xf32> to vector<8x128xf32>
    %c0_59 = arith.constant 0 : index
    %c6528 = arith.constant 6528 : index
    %137 = vector.load %arg2[%c0_59, %c6528] : memref<8x8192xf32, #tpu.memory_space<vmem>>, vector<8x128xf32>
    tpu.vector_store %arg2[%c0_59, %c6528], %136 {strides = array<i32>} : memref<8x8192xf32, #tpu.memory_space<vmem>>, vector<8x128xf32>,
    %138 = vector.extract_strided_slice %33 {offsets = [0, 11], sizes = [8, 128], strides = [1, 1]} : vector<8x191xf32> to vector<8x128xf32>
    %c0_60 = arith.constant 0 : index
    %c6656 = arith.constant 6656 : index
    %139 = vector.load %arg2[%c0_60, %c6656] : memref<8x8192xf32, #tpu.memory_space<vmem>>, vector<8x128xf32>
    tpu.vector_store %arg2[%c0_60, %c6656], %138 {strides = array<i32>} : memref<8x8192xf32, #tpu.memory_space<vmem>>, vector<8x128xf32>,
    %140 = vector.extract_strided_slice %33 {offsets = [0, 10], sizes = [8, 128], strides = [1, 1]} : vector<8x191xf32> to vector<8x128xf32>
    %c0_61 = arith.constant 0 : index
    %c6784 = arith.constant 6784 : index
    %141 = vector.load %arg2[%c0_61, %c6784] : memref<8x8192xf32, #tpu.memory_space<vmem>>, vector<8x128xf32>
    tpu.vector_store %arg2[%c0_61, %c6784], %140 {strides = array<i32>} : memref<8x8192xf32, #tpu.memory_space<vmem>>, vector<8x128xf32>,
    %142 = vector.extract_strided_slice %33 {offsets = [0, 9], sizes = [8, 128], strides = [1, 1]} : vector<8x191xf32> to vector<8x128xf32>
    %c0_62 = arith.constant 0 : index
    %c6912 = arith.constant 6912 : index
    %143 = vector.load %arg2[%c0_62, %c6912] : memref<8x8192xf32, #tpu.memory_space<vmem>>, vector<8x128xf32>
    tpu.vector_store %arg2[%c0_62, %c6912], %142 {strides = array<i32>} : memref<8x8192xf32, #tpu.memory_space<vmem>>, vector<8x128xf32>,
    %144 = vector.extract_strided_slice %33 {offsets = [0, 8], sizes = [8, 128], strides = [1, 1]} : vector<8x191xf32> to vector<8x128xf32>
    %c0_63 = arith.constant 0 : index
    %c7040 = arith.constant 7040 : index
    %145 = vector.load %arg2[%c0_63, %c7040] : memref<8x8192xf32, #tpu.memory_space<vmem>>, vector<8x128xf32>
    tpu.vector_store %arg2[%c0_63, %c7040], %144 {strides = array<i32>} : memref<8x8192xf32, #tpu.memory_space<vmem>>, vector<8x128xf32>,
    %146 = vector.extract_strided_slice %33 {offsets = [0, 7], sizes = [8, 128], strides = [1, 1]} : vector<8x191xf32> to vector<8x128xf32>
    %c0_64 = arith.constant 0 : index
    %c7168 = arith.constant 7168 : index
    %147 = vector.load %arg2[%c0_64, %c7168] : memref<8x8192xf32, #tpu.memory_space<vmem>>, vector<8x128xf32>
    tpu.vector_store %arg2[%c0_64, %c7168], %146 {strides = array<i32>} : memref<8x8192xf32, #tpu.memory_space<vmem>>, vector<8x128xf32>,
    %148 = vector.extract_strided_slice %33 {offsets = [0, 6], sizes = [8, 128], strides = [1, 1]} : vector<8x191xf32> to vector<8x128xf32>
    %c0_65 = arith.constant 0 : index
    %c7296 = arith.constant 7296 : index
    %149 = vector.load %arg2[%c0_65, %c7296] : memref<8x8192xf32, #tpu.memory_space<vmem>>, vector<8x128xf32>
    tpu.vector_store %arg2[%c0_65, %c7296], %148 {strides = array<i32>} : memref<8x8192xf32, #tpu.memory_space<vmem>>, vector<8x128xf32>,
    %150 = vector.extract_strided_slice %33 {offsets = [0, 5], sizes = [8, 128], strides = [1, 1]} : vector<8x191xf32> to vector<8x128xf32>
    %c0_66 = arith.constant 0 : index
    %c7424 = arith.constant 7424 : index
    %151 = vector.load %arg2[%c0_66, %c7424] : memref<8x8192xf32, #tpu.memory_space<vmem>>, vector<8x128xf32>
    tpu.vector_store %arg2[%c0_66, %c7424], %150 {strides = array<i32>} : memref<8x8192xf32, #tpu.memory_space<vmem>>, vector<8x128xf32>,
    %152 = vector.extract_strided_slice %33 {offsets = [0, 4], sizes = [8, 128], strides = [1, 1]} : vector<8x191xf32> to vector<8x128xf32>
    %c0_67 = arith.constant 0 : index
    %c7552 = arith.constant 7552 : index
    %153 = vector.load %arg2[%c0_67, %c7552] : memref<8x8192xf32, #tpu.memory_space<vmem>>, vector<8x128xf32>
    tpu.vector_store %arg2[%c0_67, %c7552], %152 {strides = array<i32>} : memref<8x8192xf32, #tpu.memory_space<vmem>>, vector<8x128xf32>,
    %154 = vector.extract_strided_slice %33 {offsets = [0, 3], sizes = [8, 128], strides = [1, 1]} : vector<8x191xf32> to vector<8x128xf32>
    %c0_68 = arith.constant 0 : index
    %c7680 = arith.constant 7680 : index
    %155 = vector.load %arg2[%c0_68, %c7680] : memref<8x8192xf32, #tpu.memory_space<vmem>>, vector<8x128xf32>
    tpu.vector_store %arg2[%c0_68, %c7680], %154 {strides = array<i32>} : memref<8x8192xf32, #tpu.memory_space<vmem>>, vector<8x128xf32>,
    %156 = vector.extract_strided_slice %33 {offsets = [0, 2], sizes = [8, 128], strides = [1, 1]} : vector<8x191xf32> to vector<8x128xf32>
    %c0_69 = arith.constant 0 : index
    %c7808 = arith.constant 7808 : index
    %157 = vector.load %arg2[%c0_69, %c7808] : memref<8x8192xf32, #tpu.memory_space<vmem>>, vector<8x128xf32>
    tpu.vector_store %arg2[%c0_69, %c7808], %156 {strides = array<i32>} : memref<8x8192xf32, #tpu.memory_space<vmem>>, vector<8x128xf32>,
    %158 = vector.extract_strided_slice %33 {offsets = [0, 1], sizes = [8, 128], strides = [1, 1]} : vector<8x191xf32> to vector<8x128xf32>
    %c0_70 = arith.constant 0 : index
    %c7936 = arith.constant 7936 : index
    %159 = vector.load %arg2[%c0_70, %c7936] : memref<8x8192xf32, #tpu.memory_space<vmem>>, vector<8x128xf32>
    tpu.vector_store %arg2[%c0_70, %c7936], %158 {strides = array<i32>} : memref<8x8192xf32, #tpu.memory_space<vmem>>, vector<8x128xf32>,
    %160 = vector.extract_strided_slice %33 {offsets = [0, 0], sizes = [8, 128], strides = [1, 1]} : vector<8x191xf32> to vector<8x128xf32>
    %c0_71 = arith.constant 0 : index
    %c8064 = arith.constant 8064 : index
    %161 = vector.load %arg2[%c0_71, %c8064] : memref<8x8192xf32, #tpu.memory_space<vmem>>, vector<8x128xf32>
    tpu.vector_store %arg2[%c0_71, %c8064], %160 {strides = array<i32>} : memref<8x8192xf32, #tpu.memory_space<vmem>>, vector<8x128xf32>,
    return
  }
  func.func @transform_0(%arg0: i32) -> (i32, i32) {
    %c0_i32 = arith.constant 0 : i32
    %c0_i32_0 = arith.constant 0 : i32
    %c0_i32_1 = arith.constant 0 : i32
    return %c0_i32, %c0_i32_0 : i32, i32
  }
  func.func @transform_1(%arg0: i32) -> (i32, i32) {
    %c0_i32 = arith.constant 0 : i32
    %c0_i32_0 = arith.constant 0 : i32
    return %c0_i32, %arg0 : i32, i32
  }
}

</mosaic_0001>

<bundles_post_ra>
// kernel: tpu_custom_call.1
= control target key start
LH: loop header
LB: loop body
LE: loop exit
PB: predicated region body
PF: predicated region fallthrough
CT: control target
= control target key end

     0   :  { %6 = vsyncpa [#allocation3], 0  ;;  %s1473_s0 = inlined_call_operand.hbm [shape: f32[8,32], index: 0, kind: input, shape index: {}]   ;;  %s1474_s1 = inlined_call_operand.hbm [shape: f32[8,32768], index: 1, kind: output, shape index: {}]  }
   0x1   :  { %7 = vsyncpa [#allocation4], 0 }
   0x2   :  { %9 = vsyncpa [#allocation4 + $0x1], 0  ;;  %s1159_s6 = smov 0   ;;  %s1161_s7 = smov 0  }
   0x3   :  { %s1163_s8 = smov 0   ;;  %s1165_s9 = smov 0  }
   0x4 LB: > { %s1180_s10 = sadd.s32 4294967295, %s1080_s9   ;;  %s837_s11 = sadd.s32 4294967294, %s1080_s9   ;;  %s1080_s9 = sphi %s1165_s9, %s1482_s9   ;;  %s1076_s8 = sphi %s1163_s8, %s1481_s8   ;;  %s1072_s7 = sphi %s1161_s7, %s1480_s7   ;;  %s1068_s6 = sphi %s1159_s6, %s1479_s6  }
   0x5   : > { %s1184_s12 = sadd.s32 1, %s1080_s9   ;;  %s43_s13 = sadd.s32 1, %s1076_s8 }
   0x6   : > { %s40_s14 = ssub.s32 %s1080_s9, %s1184_s12  ;;  %p53_p0 = scmp.ne.s32.totalorder %s1076_s8, %s1072_s7 }
   0x7   : > { %p41_p1 = scmp.eq.s32.totalorder %s40_s14, 0  ;;  %p54_p2 = scmp.eq.s32.totalorder %s1180_s10, 3 }
   0x8   : > { %p59_p3 = scmp.ne.s32.totalorder %s1072_s7, %s1068_s6  ;;  %p60_p4 = scmp.eq.s32.totalorder %s837_s11, 3 }
   0x9   : > { %s1195_s15 = scalar_select %p41_p1, %s1076_s8, %s43_s13  }
   0xa   : > { %p1197_p5 = por %p54_p2, %p53_p0  ;;  %p1201_p6 = por %p60_p4, %p59_p3 }
   0xb   : > { %p838_p7 = scmp.ge.s32.totalorder %s1080_s9, 1  ;;  %p67_p8 = scmp.lt.s32.totalorder %s1080_s9, 5 }
   0xc   : > { %s1476_s17 = scalar_select %p1201_p6, 1, 0 }
   0xd   : > { %p885_p9 = scmp.eq.s32.totalorder %s1180_s10, 0  ;;  %p1208_p10 = pnand %p838_p7, %p67_p8 }
   0xe   : > { %s1082_s19 = smov [#allocation2]  }
   0xf   : > { %s80_s20 = sshll.u32 %s1082_s19, 4  ;;  %p877_p11 = pneg %p1208_p10  ;;  %s81_s20 = int_to_ptr.vmem [resolvable:$true] %s80_s20 }
  0x10   : > { %s1001_s21 = scalar_lea.vmem %s81_s20, 128  ;;  %p1009_p3 = scmp.lt.s32.totalorder %s81_s20, %s81_s20 }
  0x11   : > { %p878_p12 = pnand %p885_p9, %p877_p11  ;;  %p1002_p0 = scmp.ne.s32.totalorder %s81_s20, %s1001_s21 }
  0x12   : > { %p1010_p4 = scmp.lt.s32.totalorder %s1001_s21, %s1001_s21 }
  0x13   : > { %p992_p13 = pneg %p878_p12 }
  0x14   : > { %p1011_p6 = por %p1010_p4, %p1009_p3 }
  0x15   : > { %p1004_p1 = pnand %p1002_p0, %p992_p13 }
  0x17   : > { %p1005_p2 = pneg %p1004_p1 }
  0x19   : > { %p1012_p7 = pnand %p1011_p6, %p1005_p2 }
  0x1b   : > { %1015 = shalt.err (!%p1012_p7)
}
  0x1c   : > { %880 = dma.hbm_to_vmem [thread:$0]  (!%p878_p12), %s1473_s0, 128, %s81_s20, [#allocation3]  }
  0x1d   : > { %93 = sbr.rel (%p1208_p10) target bundleno = 661 (0x295), region = 24 }
  0x22   : > { %1059 = dma.done.wait (%p885_p9), [#allocation3], 128  }
  0x23   : > { %1061 = vsyncadd (%p885_p9), [#allocation3], 4294967168  ;;  %s843_s24 = sshll.u32 %s1180_s10, 6  ;;  %v111_v0 = vlaneseq  ;;  %v1083_v1 = vmov 0.0   ;;  %v1084_v39 = vmov 1.0   ;;  %v180_v40 = vld [vmem:[#allocation2] sm:$0xff] }
  0x24   : > { %s110_s25 = sadd.s32 63, %s843_s24  ;;  %249 = vmatprep.mubr.f32.mxu0 %v1083_v1  ;;  %vm181_vm14 = vcmask 261120   ;;  %s105_s26 = sand.u32 1, %s1072_s7   ;;  %vm270_vm15 = vcmask 539648  }
  0x25   : > { %v112_v2 = vand.u32 127, %v111_v0  ;;  %v114_v3 = vstv %s110_s25  ;;  %v152_v27 = vshrl.u32 %v111_v0, 7  ;;  %s842_s27 = sshll.u32 %s105_s26, 9  ;;  %s1085_s29 = smov 66  }
  0x26   : > { %s1231_s28 = scalar_lea.vmem [#allocation5], %s842_s27  ;;  %s1086_s30 = smov 65  }
  0x27   : > { %v113_v4 = vadd.s32 128, %v112_v2  ;;  %v115_v5 = vsub.s32 %v112_v2, %v114_v3  ;;  %v155_v32 = vadd.s32 24, %v152_v27  ;;  %v154_v34 = vadd.s32 16, %v152_v27  ;;  %s1087_s2 = smov 67   ;;  %s1088_s3 = smov 68  }
  0x28   : > { %v153_v37 = vadd.s32 8, %v152_v27  ;;  %s1089_s4 = smov 69   ;;  %s1090_s5 = smov 70  }
  0x29   : > { %v116_v6 = vsub.s32 %v113_v4, %v114_v3  ;;  %v117_v7 = vsub.s32 0, %v115_v5  ;;  %s1091_s11 = smov 71   ;;  %s1092_s13 = smov 72  }
  0x2a   : > { %s1093_s14 = smov 73   ;;  %s1094_s18 = smov 74  }
  0x2b   : > { %v118_v8 = vsub.s32 0, %v116_v6  ;;  %vm119_vm0 = vcmp.gt.s32.totalorder %v117_v7, 0  ;;  %s1095_s19 = smov 75   ;;  %s1096_s20 = smov 76  }
  0x2c   : > { %v120_v9 = vsel %vm119_vm0, %v117_v7, 0  ;;  %s1097_s21 = smov 77   ;;  %s1098_s22 = smov 78   ;;  %vm278_vm0 = vcmask 547840  }
  0x2d   : > { %vm121_vm1 = vcmp.gt.s32.totalorder %v118_v8, 0  ;;  %v125_v10 = vcvt.s32.f32 %v120_v9  ;;  %vm123_vm2 = vcmp.lt.s32.totalorder %v120_v9, 16  ;;  %s1099_s23 = smov 79   ;;  %s1100_s24 = smov 80  }
  0x2e   : > { %v122_v11 = vsel %vm121_vm1, %v118_v8, 0  ;;  %s1101_s25 = smov 81   ;;  %s1102_s27 = smov 82   ;;  %vm286_vm1 = vcmask 556032  }
  0x2f   : > { %v126_v12 = vcvt.s32.f32 %v122_v11  ;;  %v127_v13 = vmax.f32 %v125_v10, 1.0  ;;  %vm124_vm4 = vcmp.lt.s32.totalorder %v122_v11, 16 }
  0x31   : > { %v128_v14 = vmax.f32 %v126_v12, 1.0  ;;  %v130_v15 = vmul.f32 0.0625, %v127_v13 }
  0x33   : > { %v131_v16 = vmul.f32 0.0625, %v128_v14  ;;  %986 = vlog2.f32 %v130_v15 }
  0x35   : > { %988 = vlog2.f32 %v131_v16 }
  0x40   : > { %v987_v17 = vpop.eup %986 }
  0x41   : > { %v133_v18 = vmul.f32 0.6931472, %v987_v17 }
  0x42   : > { %v989_v19 = vpop.eup %988 }
  0x43   : > { %v135_v20 = vmul.f32 0.6931472, %v989_v19  ;;  %v137_v21 = vmul.f32 0.48089835, %v133_v18 }
  0x45   : > { %v138_v22 = vmul.f32 0.48089835, %v135_v20  ;;  %v139_v23 = vmul.f32 16.0, %v137_v21 }
  0x47   : > { %v140_v24 = vmul.f32 16.0, %v138_v22  ;;  %v867_v25 = vtrunc.f32 %v139_v23 }
  0x49   : > { %v869_v26 = vtrunc.f32 %v140_v24  ;;  %v868_v28 = vcvt.f32.s32 %v867_v25 }
  0x4b   : > { %v870_v29 = vcvt.f32.s32 %v869_v26  ;;  %v143_v30 = vadd.s32 16, %v868_v28 }
  0x4d   : > { %v144_v31 = vadd.s32 16, %v870_v29  ;;  %vm145_vm3 = vcmp.lt.s32.totalorder %v143_v30, 31 }
  0x4e   : > { %v146_v33 = vsel %vm145_vm3, %v143_v30, 31  ;;  %vm302_vm3 = vcmask 572416  }
  0x4f   : > { %vm147_vm5 = vcmp.lt.s32.totalorder %v144_v31, 31  ;;  %v149_v35 = vsel %vm123_vm2, %v120_v9, %v146_v33  ;;  %vm294_vm2 = vcmask 564224  }
  0x50   : > { %v148_v36 = vsel %vm147_vm5, %v144_v31, 31  ;;  %vm162_vm6 = vcmp.eq.s32.totalorder %v155_v32, %v149_v35  ;;  %vm160_vm9 = vcmp.eq.s32.totalorder %v154_v34, %v149_v35  ;;  %vm158_vm11 = vcmp.eq.s32.totalorder %v153_v37, %v149_v35 }
  0x51   : > { %v150_v38 = vsel %vm124_vm4, %v122_v11, %v148_v36  ;;  %vm156_vm13 = vcmp.eq.s32.totalorder %v152_v27, %v149_v35  ;;  %vm310_vm4 = vcmask 580608   ;;  %vm318_vm5 = vcmask 588800  }
  0x52   : > { %vm163_vm7 = vcmp.eq.s32.totalorder %v155_v32, %v150_v38  ;;  %vm161_vm8 = vcmp.eq.s32.totalorder %v154_v34, %v150_v38  ;;  %vm159_vm10 = vcmp.eq.s32.totalorder %v153_v37, %v150_v38  ;;  %vm157_vm12 = vcmp.eq.s32.totalorder %v152_v27, %v150_v38 }
  0x53   : > { %852 = vmatprep.subr.msk.mxu0 %vm163_vm7, %v1084_v39  ;;  %vm334_vm7 = vcmask 605184  }
  0x54   : > { %853 = vmatpush1.msk.msra.mxu0 %vm162_vm6, %v1084_v39  ;;  %vm326_vm6 = vcmask 596992  }
  0x55   : > { %854 = vmatprep.subr.msk.mxu0 %vm161_vm8, %v1084_v39  ;;  %vm342_vm8 = vcmask 613376  }
  0x56   : > { %855 = vmatpush1.msk.msra.mxu0 %vm160_vm9, %v1084_v39  ;;  %vm350_vm9 = vcmask 621568  }
  0x57   : > { %856 = vmatprep.subr.msk.mxu0 %vm159_vm10, %v1084_v39  ;;  %vm358_vm10 = vcmask 629760  }
  0x58   : > { %857 = vmatpush1.msk.msra.mxu0 %vm158_vm11, %v1084_v39  ;;  %vm366_vm11 = vcmask 637952  }
  0x59   : > { %858 = vmatprep.subr.msk.mxu0 %vm157_vm12, %v1084_v39  ;;  %vm374_vm12 = vcmask 646144  }
  0x5a   : > { %859 = vmatpush1.msk.msra.mxu0 %vm156_vm13, %v1084_v39  ;;  %vm382_vm13 = vcmask 654336  }
  0x5b   : > { %860 = vmatmul.mubr.msk.f32.vlgmr.msra.gmra.mxu0 %vm181_vm14, %v180_v40  ;;  %vm390_vm14 = vcmask 662528  }
 0x11b   : > { %v1229_v41 = vpop.f32.mrf.mxu0 }
 0x11c   : > { %762 = vst [vmem:[%s1231_s28 + $0x1f8] sm:$0xff] %v1229_v41  ;;  %266 = vrot.lane.b32.xlu1 %v1229_v41, %s1085_s29  ;;  %258 = vrot.lane.b32.xlu0 %v1229_v41, %s1086_s30 }
 0x11d   : > { %v1238_v42 = vpop.f32.mrf.mxu0 }
 0x120   : > { %274 = vrot.lane.b32.xlu0 %v1229_v41, %s1087_s2  ;;  %268 = vrot.lane.b32.xlu1 %v1238_v42, %s1085_s29  ;;  %s1103_s29 = smov 83  }
 0x124   : > { %282 = vrot.lane.b32.xlu0 %v1229_v41, %s1088_s3  ;;  %276 = vrot.lane.b32.xlu1 %v1238_v42, %s1087_s2  ;;  %s1104_s2 = smov 84  }
 0x128   : > { %290 = vrot.lane.b32.xlu0 %v1229_v41, %s1089_s4  ;;  %284 = vrot.lane.b32.xlu1 %v1238_v42, %s1088_s3  ;;  %s1105_s3 = smov 85  }
 0x12c   : > { %298 = vrot.lane.b32.xlu0 %v1229_v41, %s1090_s5  ;;  %292 = vrot.lane.b32.xlu1 %v1238_v42, %s1089_s4  ;;  %s1106_s4 = smov 86  }
 0x130   : > { %306 = vrot.lane.b32.xlu0 %v1229_v41, %s1091_s11  ;;  %300 = vrot.lane.b32.xlu1 %v1238_v42, %s1090_s5  ;;  %s1107_s5 = smov 87  }
 0x134   : > { %314 = vrot.lane.b32.xlu0 %v1229_v41, %s1092_s13  ;;  %308 = vrot.lane.b32.xlu1 %v1238_v42, %s1091_s11  ;;  %s1108_s11 = smov 88  }
 0x138   : > { %322 = vrot.lane.b32.xlu0 %v1229_v41, %s1093_s14  ;;  %316 = vrot.lane.b32.xlu1 %v1238_v42, %s1092_s13  ;;  %s1109_s13 = smov 89  }
 0x13c   : > { %330 = vrot.lane.b32.xlu0 %v1229_v41, %s1094_s18  ;;  %324 = vrot.lane.b32.xlu1 %v1238_v42, %s1093_s14  ;;  %s1110_s14 = smov 90  }
 0x140   : > { %338 = vrot.lane.b32.xlu0 %v1229_v41, %s1095_s19  ;;  %332 = vrot.lane.b32.xlu1 %v1238_v42, %s1094_s18  ;;  %s1111_s18 = smov 91  }
 0x144   : > { %346 = vrot.lane.b32.xlu0 %v1229_v41, %s1096_s20  ;;  %340 = vrot.lane.b32.xlu1 %v1238_v42, %s1095_s19  ;;  %s1112_s19 = smov 92  }
 0x148   : > { %354 = vrot.lane.b32.xlu0 %v1229_v41, %s1097_s21  ;;  %348 = vrot.lane.b32.xlu1 %v1238_v42, %s1096_s20  ;;  %s1113_s20 = smov 93  }
 0x14c   : > { %362 = vrot.lane.b32.xlu0 %v1229_v41, %s1098_s22  ;;  %356 = vrot.lane.b32.xlu1 %v1238_v42, %s1097_s21  ;;  %s1114_s21 = smov 94  }
 0x150   : > { %370 = vrot.lane.b32.xlu0 %v1229_v41, %s1099_s23  ;;  %364 = vrot.lane.b32.xlu1 %v1238_v42, %s1098_s22  ;;  %s1115_s22 = smov 95  }
 0x154   : > { %378 = vrot.lane.b32.xlu0 %v1229_v41, %s1100_s24  ;;  %372 = vrot.lane.b32.xlu1 %v1238_v42, %s1099_s23  ;;  %s1116_s23 = smov 96  }
 0x158   : > { %386 = vrot.lane.b32.xlu0 %v1229_v41, %s1101_s25  ;;  %380 = vrot.lane.b32.xlu1 %v1238_v42, %s1100_s24  ;;  %s1117_s24 = smov 97  }
 0x15c   : > { %394 = vrot.lane.b32.xlu0 %v1229_v41, %s1102_s27  ;;  %388 = vrot.lane.b32.xlu1 %v1238_v42, %s1101_s25  ;;  %s1118_s25 = smov 98  }
 0x160   : > { %402 = vrot.lane.b32.xlu0 %v1229_v41, %s1103_s29  ;;  %396 = vrot.lane.b32.xlu1 %v1238_v42, %s1102_s27  ;;  %s1119_s27 = smov 99  }
 0x164   : > { %410 = vrot.lane.b32.xlu0 %v1229_v41, %s1104_s2  ;;  %404 = vrot.lane.b32.xlu1 %v1238_v42, %s1103_s29  ;;  %s1120_s29 = smov 100  }
 0x168   : > { %418 = vrot.lane.b32.xlu0 %v1229_v41, %s1105_s3  ;;  %412 = vrot.lane.b32.xlu1 %v1238_v42, %s1104_s2  ;;  %s1121_s2 = smov 101  }
 0x16c   : > { %426 = vrot.lane.b32.xlu0 %v1229_v41, %s1106_s4  ;;  %420 = vrot.lane.b32.xlu1 %v1238_v42, %s1105_s3  ;;  %s1122_s3 = smov 102  }
 0x170   : > { %434 = vrot.lane.b32.xlu0 %v1229_v41, %s1107_s5  ;;  %428 = vrot.lane.b32.xlu1 %v1238_v42, %s1106_s4  ;;  %s1123_s4 = smov 103  }
 0x174   : > { %442 = vrot.lane.b32.xlu0 %v1229_v41, %s1108_s11  ;;  %436 = vrot.lane.b32.xlu1 %v1238_v42, %s1107_s5  ;;  %s1124_s5 = smov 104  }
 0x178   : > { %450 = vrot.lane.b32.xlu0 %v1229_v41, %s1109_s13  ;;  %444 = vrot.lane.b32.xlu1 %v1238_v42, %s1108_s11  ;;  %s1125_s11 = smov 105  }
 0x17c   : > { %458 = vrot.lane.b32.xlu0 %v1229_v41, %s1110_s14  ;;  %452 = vrot.lane.b32.xlu1 %v1238_v42, %s1109_s13  ;;  %s1126_s13 = smov 106  }
 0x180   : > { %466 = vrot.lane.b32.xlu0 %v1229_v41, %s1111_s18  ;;  %460 = vrot.lane.b32.xlu1 %v1238_v42, %s1110_s14  ;;  %s1127_s14 = smov 107  }
 0x184   : > { %474 = vrot.lane.b32.xlu0 %v1229_v41, %s1112_s19  ;;  %468 = vrot.lane.b32.xlu1 %v1238_v42, %s1111_s18  ;;  %s1128_s18 = smov 108  }
 0x188   : > { %482 = vrot.lane.b32.xlu0 %v1229_v41, %s1113_s20  ;;  %476 = vrot.lane.b32.xlu1 %v1238_v42, %s1112_s19  ;;  %s1129_s19 = smov 109  }
 0x18c   : > { %490 = vrot.lane.b32.xlu0 %v1229_v41, %s1114_s21  ;;  %484 = vrot.lane.b32.xlu1 %v1238_v42, %s1113_s20  ;;  %s1130_s20 = smov 110  }
 0x18e   : > { %v267_v43 = vpop.permute.xlu1 %266  ;;  %v1296_v44 = vpop.permute.xlu0 %258 }
 0x190   : > { %498 = vrot.lane.b32.xlu0 %v1229_v41, %s1115_s22  ;;  %492 = vrot.lane.b32.xlu1 %v1238_v42, %s1114_s21  ;;  %s1131_s21 = smov 111  }
 0x192   : > { %v275_v45 = vpop.permute.xlu0 %274  ;;  %v269_v46 = vpop.permute.xlu1 %268 }
 0x193   : > { %v271_v47 = vsel %vm270_vm15, %v267_v43, %v269_v46  ;;  %vm398_vm15 = vcmask 670720  }
 0x194   : > { %273 = vst [vmem:[%s1231_s28 + $0x8] sm:$0xff] %v271_v47  ;;  %506 = vrot.lane.b32.xlu0 %v1229_v41, %s1116_s23  ;;  %500 = vrot.lane.b32.xlu1 %v1238_v42, %s1115_s22  ;;  %s1132_s22 = smov 112  }
 0x196   : > { %v283_v48 = vpop.permute.xlu0 %282  ;;  %v277_v49 = vpop.permute.xlu1 %276 }
 0x197   : > { %v279_v50 = vsel %vm278_vm0, %v275_v45, %v277_v49  ;;  %vm406_vm0 = vcmask 678912  }
 0x198   : > { %281 = vst [vmem:[%s1231_s28 + $0x10] sm:$0xff] %v279_v50  ;;  %514 = vrot.lane.b32.xlu0 %v1229_v41, %s1117_s24  ;;  %508 = vrot.lane.b32.xlu1 %v1238_v42, %s1116_s23  ;;  %s1133_s23 = smov 113  }
 0x19a   : > { %v291_v51 = vpop.permute.xlu0 %290  ;;  %v285_v52 = vpop.permute.xlu1 %284 }
 0x19b   : > { %v287_v53 = vsel %vm286_vm1, %v283_v48, %v285_v52  ;;  %vm414_vm1 = vcmask 687104  }
 0x19c   : > { %289 = vst [vmem:[%s1231_s28 + $0x18] sm:$0xff] %v287_v53  ;;  %522 = vrot.lane.b32.xlu0 %v1229_v41, %s1118_s25  ;;  %516 = vrot.lane.b32.xlu1 %v1238_v42, %s1117_s24  ;;  %s1134_s24 = smov 114  }
 0x19e   : > { %v299_v54 = vpop.permute.xlu0 %298  ;;  %v293_v55 = vpop.permute.xlu1 %292 }
 0x19f   : > { %v295_v56 = vsel %vm294_vm2, %v291_v51, %v293_v55  ;;  %vm422_vm2 = vcmask 695296  }
 0x1a0   : > { %297 = vst [vmem:[%s1231_s28 + $0x20] sm:$0xff] %v295_v56  ;;  %530 = vrot.lane.b32.xlu0 %v1229_v41, %s1119_s27  ;;  %524 = vrot.lane.b32.xlu1 %v1238_v42, %s1118_s25  ;;  %s1135_s25 = smov 115  }
 0x1a2   : > { %v307_v57 = vpop.permute.xlu0 %306  ;;  %v301_v58 = vpop.permute.xlu1 %300 }
 0x1a3   : > { %v303_v59 = vsel %vm302_vm3, %v299_v54, %v301_v58  ;;  %vm430_vm3 = vcmask 703488  }
 0x1a4   : > { %305 = vst [vmem:[%s1231_s28 + $0x28] sm:$0xff] %v303_v59  ;;  %538 = vrot.lane.b32.xlu0 %v1229_v41, %s1120_s29  ;;  %532 = vrot.lane.b32.xlu1 %v1238_v42, %s1119_s27  ;;  %s1136_s27 = smov 116  }
 0x1a6   : > { %v315_v60 = vpop.permute.xlu0 %314  ;;  %v309_v61 = vpop.permute.xlu1 %308 }
 0x1a7   : > { %v311_v62 = vsel %vm310_vm4, %v307_v57, %v309_v61  ;;  %vm438_vm4 = vcmask 711680  }
 0x1a8   : > { %313 = vst [vmem:[%s1231_s28 + $0x30] sm:$0xff] %v311_v62  ;;  %546 = vrot.lane.b32.xlu0 %v1229_v41, %s1121_s2  ;;  %540 = vrot.lane.b32.xlu1 %v1238_v42, %s1120_s29  ;;  %s1137_s29 = smov 117  }
 0x1aa   : > { %v323_v63 = vpop.permute.xlu0 %322  ;;  %v317_v0 = vpop.permute.xlu1 %316 }
 0x1ab   : > { %v319_v1 = vsel %vm318_vm5, %v315_v60, %v317_v0  ;;  %vm446_vm5 = vcmask 719872  }
 0x1ac   : > { %321 = vst [vmem:[%s1231_s28 + $0x38] sm:$0xff] %v319_v1  ;;  %554 = vrot.lane.b32.xlu0 %v1229_v41, %s1122_s3  ;;  %548 = vrot.lane.b32.xlu1 %v1238_v42, %s1121_s2  ;;  %s1138_s2 = smov 118  }
 0x1ae   : > { %v331_v2 = vpop.permute.xlu0 %330  ;;  %v325_v3 = vpop.permute.xlu1 %324 }
 0x1af   : > { %v327_v4 = vsel %vm326_vm6, %v323_v63, %v325_v3  ;;  %vm454_vm6 = vcmask 728064  }
 0x1b0   : > { %329 = vst [vmem:[%s1231_s28 + $0x40] sm:$0xff] %v327_v4  ;;  %562 = vrot.lane.b32.xlu0 %v1229_v41, %s1123_s4  ;;  %556 = vrot.lane.b32.xlu1 %v1238_v42, %s1122_s3  ;;  %s1139_s3 = smov 119  }
 0x1b2   : > { %v339_v5 = vpop.permute.xlu0 %338  ;;  %v333_v6 = vpop.permute.xlu1 %332 }
 0x1b3   : > { %v335_v7 = vsel %vm334_vm7, %v331_v2, %v333_v6  ;;  %vm462_vm7 = vcmask 736256  }
 0x1b4   : > { %337 = vst [vmem:[%s1231_s28 + $0x48] sm:$0xff] %v335_v7  ;;  %570 = vrot.lane.b32.xlu0 %v1229_v41, %s1124_s5  ;;  %564 = vrot.lane.b32.xlu1 %v1238_v42, %s1123_s4  ;;  %s1140_s4 = smov 120  }
 0x1b6   : > { %v347_v8 = vpop.permute.xlu0 %346  ;;  %v341_v9 = vpop.permute.xlu1 %340 }
 0x1b7   : > { %v343_v10 = vsel %vm342_vm8, %v339_v5, %v341_v9  ;;  %vm470_vm8 = vcmask 744448  }
 0x1b8   : > { %345 = vst [vmem:[%s1231_s28 + $0x50] sm:$0xff] %v343_v10  ;;  %578 = vrot.lane.b32.xlu0 %v1229_v41, %s1125_s11  ;;  %572 = vrot.lane.b32.xlu1 %v1238_v42, %s1124_s5  ;;  %s1141_s5 = smov 121  }
 0x1ba   : > { %v355_v11 = vpop.permute.xlu0 %354  ;;  %v349_v12 = vpop.permute.xlu1 %348 }
 0x1bb   : > { %v351_v13 = vsel %vm350_vm9, %v347_v8, %v349_v12  ;;  %vm478_vm9 = vcmask 752640  }
 0x1bc   : > { %353 = vst [vmem:[%s1231_s28 + $0x58] sm:$0xff] %v351_v13  ;;  %586 = vrot.lane.b32.xlu0 %v1229_v41, %s1126_s13  ;;  %580 = vrot.lane.b32.xlu1 %v1238_v42, %s1125_s11  ;;  %s1142_s11 = smov 122  }
 0x1be   : > { %v363_v14 = vpop.permute.xlu0 %362  ;;  %v357_v15 = vpop.permute.xlu1 %356 }
 0x1bf   : > { %v359_v16 = vsel %vm358_vm10, %v355_v11, %v357_v15  ;;  %vm486_vm10 = vcmask 760832  }
 0x1c0   : > { %361 = vst [vmem:[%s1231_s28 + $0x60] sm:$0xff] %v359_v16  ;;  %594 = vrot.lane.b32.xlu0 %v1229_v41, %s1127_s14  ;;  %588 = vrot.lane.b32.xlu1 %v1238_v42, %s1126_s13  ;;  %s1143_s13 = smov 123  }
 0x1c2   : > { %v371_v17 = vpop.permute.xlu0 %370  ;;  %v365_v18 = vpop.permute.xlu1 %364 }
 0x1c3   : > { %v367_v19 = vsel %vm366_vm11, %v363_v14, %v365_v18  ;;  %vm494_vm11 = vcmask 769024  }
 0x1c4   : > { %369 = vst [vmem:[%s1231_s28 + $0x68] sm:$0xff] %v367_v19  ;;  %602 = vrot.lane.b32.xlu0 %v1229_v41, %s1128_s18  ;;  %596 = vrot.lane.b32.xlu1 %v1238_v42, %s1127_s14  ;;  %s1144_s14 = smov 124  }
 0x1c6   : > { %v379_v20 = vpop.permute.xlu0 %378  ;;  %v373_v21 = vpop.permute.xlu1 %372 }
 0x1c7   : > { %v375_v22 = vsel %vm374_vm12, %v371_v17, %v373_v21  ;;  %vm502_vm12 = vcmask 777216  }
 0x1c8   : > { %377 = vst [vmem:[%s1231_s28 + $0x70] sm:$0xff] %v375_v22  ;;  %610 = vrot.lane.b32.xlu0 %v1229_v41, %s1129_s19  ;;  %604 = vrot.lane.b32.xlu1 %v1238_v42, %s1128_s18  ;;  %s1145_s18 = smov 125  }
 0x1ca   : > { %v387_v23 = vpop.permute.xlu0 %386  ;;  %v381_v24 = vpop.permute.xlu1 %380 }
 0x1cb   : > { %v383_v25 = vsel %vm382_vm13, %v379_v20, %v381_v24  ;;  %vm510_vm13 = vcmask 785408  }
 0x1cc   : > { %385 = vst [vmem:[%s1231_s28 + $0x78] sm:$0xff] %v383_v25  ;;  %618 = vrot.lane.b32.xlu0 %v1229_v41, %s1130_s20  ;;  %612 = vrot.lane.b32.xlu1 %v1238_v42, %s1129_s19  ;;  %s1146_s19 = smov 126  }
 0x1ce   : > { %v395_v26 = vpop.permute.xlu0 %394  ;;  %v389_v27 = vpop.permute.xlu1 %388 }
 0x1cf   : > { %v391_v28 = vsel %vm390_vm14, %v387_v23, %v389_v27  ;;  %vm518_vm14 = vcmask 793600  }
 0x1d0   : > { %393 = vst [vmem:[%s1231_s28 + $0x80] sm:$0xff] %v391_v28  ;;  %626 = vrot.lane.b32.xlu0 %v1229_v41, %s1131_s21  ;;  %620 = vrot.lane.b32.xlu1 %v1238_v42, %s1130_s20  ;;  %s1147_s20 = smov 127  }
 0x1d2   : > { %v403_v29 = vpop.permute.xlu0 %402  ;;  %v397_v30 = vpop.permute.xlu1 %396 }
 0x1d3   : > { %v399_v31 = vsel %vm398_vm15, %v395_v26, %v397_v30  ;;  %vm526_vm15 = vcmask 801792  }
 0x1d4   : > { %401 = vst [vmem:[%s1231_s28 + $0x88] sm:$0xff] %v399_v31  ;;  %634 = vrot.lane.b32.xlu0 %v1229_v41, %s1132_s22  ;;  %628 = vrot.lane.b32.xlu1 %v1238_v42, %s1131_s21  ;;  %s778_s21 = sshll.u32 %s1231_s28, 4  ;;  %s779_s21 = int_to_ptr.vmem [resolvable:$true] %s778_s21 }
 0x1d6   : > { %v411_v32 = vpop.permute.xlu0 %410  ;;  %v405_v33 = vpop.permute.xlu1 %404 }
 0x1d7   : > { %v407_v34 = vsel %vm406_vm0, %v403_v29, %v405_v33  ;;  %vm534_vm0 = vcmask 809984  }
 0x1d8   : > { %409 = vst [vmem:[%s1231_s28 + $0x90] sm:$0xff] %v407_v34  ;;  %642 = vrot.lane.b32.xlu0 %v1229_v41, %s1133_s23  ;;  %636 = vrot.lane.b32.xlu1 %v1238_v42, %s1132_s22 }
 0x1da   : > { %v419_v35 = vpop.permute.xlu0 %418  ;;  %v413_v36 = vpop.permute.xlu1 %412 }
 0x1db   : > { %v415_v37 = vsel %vm414_vm1, %v411_v32, %v413_v36  ;;  %vm542_vm1 = vcmask 818176  }
 0x1dc   : > { %417 = vst [vmem:[%s1231_s28 + $0x98] sm:$0xff] %v415_v37  ;;  %650 = vrot.lane.b32.xlu0 %v1229_v41, %s1134_s24  ;;  %644 = vrot.lane.b32.xlu1 %v1238_v42, %s1133_s23 }
 0x1de   : > { %v427_v38 = vpop.permute.xlu0 %426  ;;  %v421_v39 = vpop.permute.xlu1 %420 }
 0x1df   : > { %v423_v40 = vsel %vm422_vm2, %v419_v35, %v421_v39  ;;  %vm550_vm2 = vcmask 826368  }
 0x1e0   : > { %425 = vst [vmem:[%s1231_s28 + $0xa0] sm:$0xff] %v423_v40  ;;  %658 = vrot.lane.b32.xlu0 %v1229_v41, %s1135_s25  ;;  %652 = vrot.lane.b32.xlu1 %v1238_v42, %s1134_s24 }
 0x1e2   : > { %v435_v43 = vpop.permute.xlu0 %434  ;;  %v429_v45 = vpop.permute.xlu1 %428 }
 0x1e3   : > { %v431_v46 = vsel %vm430_vm3, %v427_v38, %v429_v45  ;;  %vm558_vm3 = vcmask 834560  }
 0x1e4   : > { %433 = vst [vmem:[%s1231_s28 + $0xa8] sm:$0xff] %v431_v46  ;;  %666 = vrot.lane.b32.xlu0 %v1229_v41, %s1136_s27  ;;  %660 = vrot.lane.b32.xlu1 %v1238_v42, %s1135_s25  ;;  %s764_s25 = scalar_lea.sflag [#allocation4], %s105_s26 }
 0x1e6   : > { %v443_v47 = vpop.permute.xlu0 %442  ;;  %v437_v48 = vpop.permute.xlu1 %436 }
 0x1e7   : > { %v439_v49 = vsel %vm438_vm4, %v435_v43, %v437_v48  ;;  %vm566_vm4 = vcmask 842752  }
 0x1e8   : > { %441 = vst [vmem:[%s1231_s28 + $0xb0] sm:$0xff] %v439_v49  ;;  %674 = vrot.lane.b32.xlu0 %v1229_v41, %s1137_s29  ;;  %668 = vrot.lane.b32.xlu1 %v1238_v42, %s1136_s27  ;;  %s1016_s27 = scalar_lea.vmem %s779_s21, 8192 }
 0x1e9   : > { %p1017_p6 = scmp.ne.s32.totalorder %s779_s21, %s1016_s27 }
 0x1ea   : > { %v451_v50 = vpop.permute.xlu0 %450  ;;  %v445_v51 = vpop.permute.xlu1 %444 }
 0x1eb   : > { %v447_v52 = vsel %vm446_vm5, %v443_v47, %v445_v51  ;;  %vm574_vm5 = vcmask 850944   ;;  %p1018_p8 = pnand %p1017_p6, %p1197_p5 }
 0x1ec   : > { %449 = vst [vmem:[%s1231_s28 + $0xb8] sm:$0xff] %v447_v52  ;;  %682 = vrot.lane.b32.xlu0 %v1229_v41, %s1138_s2  ;;  %676 = vrot.lane.b32.xlu1 %v1238_v42, %s1137_s29 }
 0x1ed   : > { %p1019_p9 = pneg %p1018_p8 }
 0x1ee   : > { %v459_v53 = vpop.permute.xlu0 %458  ;;  %v453_v54 = vpop.permute.xlu1 %452 }
 0x1ef   : > { %v455_v55 = vsel %vm454_vm6, %v451_v50, %v453_v54  ;;  %vm582_vm6 = vcmask 859136  }
 0x1f0   : > { %457 = vst [vmem:[%s1231_s28 + $0xc0] sm:$0xff] %v455_v55  ;;  %690 = vrot.lane.b32.xlu0 %v1229_v41, %s1139_s3  ;;  %684 = vrot.lane.b32.xlu1 %v1238_v42, %s1138_s2 }
 0x1f2   : > { %v467_v56 = vpop.permute.xlu0 %466  ;;  %v461_v57 = vpop.permute.xlu1 %460 }
 0x1f3   : > { %v463_v58 = vsel %vm462_vm7, %v459_v53, %v461_v57  ;;  %vm590_vm7 = vcmask 867328  }
 0x1f4   : > { %465 = vst [vmem:[%s1231_s28 + $0xc8] sm:$0xff] %v463_v58  ;;  %698 = vrot.lane.b32.xlu0 %v1229_v41, %s1140_s4  ;;  %692 = vrot.lane.b32.xlu1 %v1238_v42, %s1139_s3 }
 0x1f6   : > { %v475_v59 = vpop.permute.xlu0 %474  ;;  %v469_v60 = vpop.permute.xlu1 %468 }
 0x1f7   : > { %v471_v61 = vsel %vm470_vm8, %v467_v56, %v469_v60  ;;  %vm598_vm8 = vcmask 875520  }
 0x1f8   : > { %473 = vst [vmem:[%s1231_s28 + $0xd0] sm:$0xff] %v471_v61  ;;  %706 = vrot.lane.b32.xlu0 %v1229_v41, %s1141_s5  ;;  %700 = vrot.lane.b32.xlu1 %v1238_v42, %s1140_s4 }
 0x1fa   : > { %v483_v62 = vpop.permute.xlu0 %482  ;;  %v477_v63 = vpop.permute.xlu1 %476 }
 0x1fb   : > { %v479_v0 = vsel %vm478_vm9, %v475_v59, %v477_v63  ;;  %vm606_vm9 = vcmask 883712  }
 0x1fc   : > { %481 = vst [vmem:[%s1231_s28 + $0xd8] sm:$0xff] %v479_v0  ;;  %714 = vrot.lane.b32.xlu0 %v1229_v41, %s1142_s11  ;;  %708 = vrot.lane.b32.xlu1 %v1238_v42, %s1141_s5 }
 0x1fe   : > { %v491_v1 = vpop.permute.xlu0 %490  ;;  %v485_v2 = vpop.permute.xlu1 %484 }
 0x1ff   : > { %v487_v3 = vsel %vm486_vm10, %v483_v62, %v485_v2  ;;  %vm614_vm10 = vcmask 891904  }
 0x200   : > { %489 = vst [vmem:[%s1231_s28 + $0xe0] sm:$0xff] %v487_v3  ;;  %722 = vrot.lane.b32.xlu0 %v1229_v41, %s1143_s13  ;;  %716 = vrot.lane.b32.xlu1 %v1238_v42, %s1142_s11 }
 0x202   : > { %v499_v4 = vpop.permute.xlu0 %498  ;;  %v493_v5 = vpop.permute.xlu1 %492 }
 0x203   : > { %v495_v6 = vsel %vm494_vm11, %v491_v1, %v493_v5  ;;  %vm622_vm11 = vcmask 900096  }
 0x204   : > { %497 = vst [vmem:[%s1231_s28 + $0xe8] sm:$0xff] %v495_v6  ;;  %730 = vrot.lane.b32.xlu0 %v1229_v41, %s1144_s14  ;;  %724 = vrot.lane.b32.xlu1 %v1238_v42, %s1143_s13 }
 0x206   : > { %v507_v7 = vpop.permute.xlu0 %506  ;;  %v501_v8 = vpop.permute.xlu1 %500 }
 0x207   : > { %v503_v9 = vsel %vm502_vm12, %v499_v4, %v501_v8  ;;  %vm630_vm12 = vcmask 908288  }
 0x208   : > { %505 = vst [vmem:[%s1231_s28 + $0xf0] sm:$0xff] %v503_v9  ;;  %738 = vrot.lane.b32.xlu0 %v1229_v41, %s1145_s18  ;;  %732 = vrot.lane.b32.xlu1 %v1238_v42, %s1144_s14 }
 0x20a   : > { %v515_v10 = vpop.permute.xlu0 %514  ;;  %v509_v11 = vpop.permute.xlu1 %508 }
 0x20b   : > { %v511_v12 = vsel %vm510_vm13, %v507_v7, %v509_v11  ;;  %vm638_vm13 = vcmask 916480  }
 0x20c   : > { %513 = vst [vmem:[%s1231_s28 + $0xf8] sm:$0xff] %v511_v12  ;;  %746 = vrot.lane.b32.xlu0 %v1229_v41, %s1146_s19  ;;  %740 = vrot.lane.b32.xlu1 %v1238_v42, %s1145_s18 }
 0x20e   : > { %v523_v13 = vpop.permute.xlu0 %522  ;;  %v517_v14 = vpop.permute.xlu1 %516 }
 0x20f   : > { %v519_v15 = vsel %vm518_vm14, %v515_v10, %v517_v14  ;;  %vm646_vm14 = vcmask 924672  }
 0x210   : > { %521 = vst [vmem:[%s1231_s28 + $0x100] sm:$0xff] %v519_v15  ;;  %748 = vrot.lane.b32.xlu1 %v1238_v42, %s1146_s19  ;;  %260 = vrot.lane.b32.xlu0 %v1238_v42, %s1086_s30  ;;  %s866_s30 = sshll.u32 %s1180_s10, 13  ;;  %s1148_s10 = smov [#allocation5]  }
 0x211   : > { %s1435_s24 = scalar_lea.hbm %s1474_s1, %s866_s30  ;;  %s1020_s29 = sshll.u32 %s1148_s10, 4  ;;  %s1021_s29 = int_to_ptr.vmem [resolvable:$false] %s1020_s29 }
 0x212   : > { %v531_v16 = vpop.permute.xlu0 %530  ;;  %v525_v17 = vpop.permute.xlu1 %524  ;;  %s1022_s2 = scalar_lea.vmem %s1021_s29, 16384  ;;  %p1023_p10 = scmp.lt.s32.totalorder %s779_s21, %s1021_s29 }
 0x213   : > { %v527_v18 = vsel %vm526_vm15, %v523_v13, %v525_v17  ;;  %vm654_vm15 = vcmask 932864   ;;  %p1024_p11 = scmp.lt.s32.totalorder %s1022_s2, %s1016_s27 }
 0x214   : > { %529 = vst [vmem:[%s1231_s28 + $0x108] sm:$0xff] %v527_v18  ;;  %756 = vrot.lane.b32.xlu1 %v1238_v42, %s1147_s20  ;;  %754 = vrot.lane.b32.xlu0 %v1229_v41, %s1147_s20 }
 0x215   : > { %p1025_p12 = por %p1024_p11, %p1023_p10 }
 0x216   : > { %v539_v19 = vpop.permute.xlu0 %538  ;;  %v533_v20 = vpop.permute.xlu1 %532 }
 0x217   : > { %v535_v21 = vsel %vm534_vm0, %v531_v16, %v533_v20  ;;  %vm662_vm0 = vcmask 941056   ;;  %p1026_p13 = pnand %p1025_p12, %p1019_p9 }
 0x218   : > { %537 = vst [vmem:[%s1231_s28 + $0x110] sm:$0xff] %v535_v21 }
 0x21a   : > { %v547_v22 = vpop.permute.xlu0 %546  ;;  %v541_v23 = vpop.permute.xlu1 %540 }
 0x21b   : > { %v543_v24 = vsel %vm542_vm1, %v539_v19, %v541_v23  ;;  %vm670_vm1 = vcmask 949248  }
 0x21c   : > { %545 = vst [vmem:[%s1231_s28 + $0x118] sm:$0xff] %v543_v24 }
 0x21e   : > { %v555_v25 = vpop.permute.xlu0 %554  ;;  %v549_v26 = vpop.permute.xlu1 %548 }
 0x21f   : > { %v551_v27 = vsel %vm550_vm2, %v547_v22, %v549_v26  ;;  %vm678_vm2 = vcmask 957440  }
 0x220   : > { %553 = vst [vmem:[%s1231_s28 + $0x120] sm:$0xff] %v551_v27 }
 0x222   : > { %v563_v41 = vpop.permute.xlu0 %562  ;;  %v557_v42 = vpop.permute.xlu1 %556 }
 0x223   : > { %v559_v28 = vsel %vm558_vm3, %v555_v25, %v557_v42  ;;  %vm686_vm3 = vcmask 965632  }
 0x224   : > { %561 = vst [vmem:[%s1231_s28 + $0x128] sm:$0xff] %v559_v28 }
 0x226   : > { %v571_v29 = vpop.permute.xlu0 %570  ;;  %v565_v30 = vpop.permute.xlu1 %564 }
 0x227   : > { %v567_v31 = vsel %vm566_vm4, %v563_v41, %v565_v30  ;;  %vm694_vm4 = vcmask 973824  }
 0x228   : > { %569 = vst [vmem:[%s1231_s28 + $0x130] sm:$0xff] %v567_v31 }
 0x22a   : > { %v579_v32 = vpop.permute.xlu0 %578  ;;  %v573_v33 = vpop.permute.xlu1 %572 }
 0x22b   : > { %v575_v34 = vsel %vm574_vm5, %v571_v29, %v573_v33  ;;  %vm702_vm5 = vcmask 982016  }
 0x22c   : > { %577 = vst [vmem:[%s1231_s28 + $0x138] sm:$0xff] %v575_v34 }
 0x22e   : > { %v587_v35 = vpop.permute.xlu0 %586  ;;  %v581_v36 = vpop.permute.xlu1 %580 }
 0x22f   : > { %v583_v37 = vsel %vm582_vm6, %v579_v32, %v581_v36  ;;  %vm710_vm6 = vcmask 990208  }
 0x230   : > { %585 = vst [vmem:[%s1231_s28 + $0x140] sm:$0xff] %v583_v37 }
 0x232   : > { %v595_v38 = vpop.permute.xlu0 %594  ;;  %v589_v39 = vpop.permute.xlu1 %588 }
 0x233   : > { %v591_v40 = vsel %vm590_vm7, %v587_v35, %v589_v39  ;;  %vm718_vm7 = vcmask 998400  }
 0x234   : > { %593 = vst [vmem:[%s1231_s28 + $0x148] sm:$0xff] %v591_v40 }
 0x236   : > { %v603_v43 = vpop.permute.xlu0 %602  ;;  %v597_v45 = vpop.permute.xlu1 %596 }
 0x237   : > { %v599_v46 = vsel %vm598_vm8, %v595_v38, %v597_v45  ;;  %vm726_vm8 = vcmask 1006592  }
 0x238   : > { %601 = vst [vmem:[%s1231_s28 + $0x150] sm:$0xff] %v599_v46 }
 0x23a   : > { %v611_v47 = vpop.permute.xlu0 %610  ;;  %v605_v48 = vpop.permute.xlu1 %604 }
 0x23b   : > { %v607_v49 = vsel %vm606_vm9, %v603_v43, %v605_v48  ;;  %vm734_vm9 = vcmask 1014784  }
 0x23c   : > { %609 = vst [vmem:[%s1231_s28 + $0x158] sm:$0xff] %v607_v49 }
 0x23e   : > { %v619_v50 = vpop.permute.xlu0 %618  ;;  %v613_v51 = vpop.permute.xlu1 %612 }
 0x23f   : > { %v615_v52 = vsel %vm614_vm10, %v611_v47, %v613_v51  ;;  %vm742_vm10 = vcmask 1022976  }
 0x240   : > { %617 = vst [vmem:[%s1231_s28 + $0x160] sm:$0xff] %v615_v52 }
 0x242   : > { %v627_v53 = vpop.permute.xlu0 %626  ;;  %v621_v54 = vpop.permute.xlu1 %620 }
 0x243   : > { %v623_v55 = vsel %vm622_vm11, %v619_v50, %v621_v54  ;;  %vm750_vm11 = vcmask 1031168  }
 0x244   : > { %625 = vst [vmem:[%s1231_s28 + $0x168] sm:$0xff] %v623_v55 }
 0x246   : > { %v635_v56 = vpop.permute.xlu0 %634  ;;  %v629_v57 = vpop.permute.xlu1 %628 }
 0x247   : > { %v631_v58 = vsel %vm630_vm12, %v627_v53, %v629_v57  ;;  %vm262_vm12 = vcmask 531456  }
 0x248   : > { %633 = vst [vmem:[%s1231_s28 + $0x170] sm:$0xff] %v631_v58 }
 0x24a   : > { %v643_v59 = vpop.permute.xlu0 %642  ;;  %v637_v60 = vpop.permute.xlu1 %636 }
 0x24b   : > { %v639_v61 = vsel %vm638_vm13, %v635_v56, %v637_v60  ;;  %vm758_vm13 = vcmask 1039360  }
 0x24c   : > { %641 = vst [vmem:[%s1231_s28 + $0x178] sm:$0xff] %v639_v61 }
 0x24e   : > { %v651_v62 = vpop.permute.xlu0 %650  ;;  %v645_v63 = vpop.permute.xlu1 %644 }
 0x24f   : > { %v647_v0 = vsel %vm646_vm14, %v643_v59, %v645_v63 }
 0x250   : > { %649 = vst [vmem:[%s1231_s28 + $0x180] sm:$0xff] %v647_v0 }
 0x252   : > { %v659_v1 = vpop.permute.xlu0 %658  ;;  %v653_v2 = vpop.permute.xlu1 %652 }
 0x253   : > { %v655_v3 = vsel %vm654_vm15, %v651_v62, %v653_v2 }
 0x254   : > { %657 = vst [vmem:[%s1231_s28 + $0x188] sm:$0xff] %v655_v3 }
 0x256   : > { %v667_v4 = vpop.permute.xlu0 %666  ;;  %v661_v5 = vpop.permute.xlu1 %660 }
 0x257   : > { %v663_v6 = vsel %vm662_vm0, %v659_v1, %v661_v5 }
 0x258   : > { %665 = vst [vmem:[%s1231_s28 + $0x190] sm:$0xff] %v663_v6 }
 0x25a   : > { %v675_v7 = vpop.permute.xlu0 %674  ;;  %v669_v8 = vpop.permute.xlu1 %668 }
 0x25b   : > { %v671_v9 = vsel %vm670_vm1, %v667_v4, %v669_v8 }
 0x25c   : > { %673 = vst [vmem:[%s1231_s28 + $0x198] sm:$0xff] %v671_v9 }
 0x25e   : > { %v683_v10 = vpop.permute.xlu0 %682  ;;  %v677_v11 = vpop.permute.xlu1 %676 }
 0x25f   : > { %v679_v12 = vsel %vm678_vm2, %v675_v7, %v677_v11 }
 0x260   : > { %681 = vst [vmem:[%s1231_s28 + $0x1a0] sm:$0xff] %v679_v12 }
 0x262   : > { %v691_v13 = vpop.permute.xlu0 %690  ;;  %v685_v14 = vpop.permute.xlu1 %684 }
 0x263   : > { %v687_v15 = vsel %vm686_vm3, %v683_v10, %v685_v14 }
 0x264   : > { %689 = vst [vmem:[%s1231_s28 + $0x1a8] sm:$0xff] %v687_v15 }
 0x266   : > { %v699_v16 = vpop.permute.xlu0 %698  ;;  %v693_v17 = vpop.permute.xlu1 %692 }
 0x267   : > { %v695_v18 = vsel %vm694_vm4, %v691_v13, %v693_v17 }
 0x268   : > { %697 = vst [vmem:[%s1231_s28 + $0x1b0] sm:$0xff] %v695_v18 }
 0x26a   : > { %v707_v19 = vpop.permute.xlu0 %706  ;;  %v701_v20 = vpop.permute.xlu1 %700 }
 0x26b   : > { %v703_v21 = vsel %vm702_vm5, %v699_v16, %v701_v20 }
 0x26c   : > { %705 = vst [vmem:[%s1231_s28 + $0x1b8] sm:$0xff] %v703_v21 }
 0x26e   : > { %v715_v22 = vpop.permute.xlu0 %714  ;;  %v709_v23 = vpop.permute.xlu1 %708 }
 0x26f   : > { %v711_v24 = vsel %vm710_vm6, %v707_v19, %v709_v23 }
 0x270   : > { %713 = vst [vmem:[%s1231_s28 + $0x1c0] sm:$0xff] %v711_v24 }
 0x272   : > { %v723_v25 = vpop.permute.xlu0 %722  ;;  %v717_v26 = vpop.permute.xlu1 %716 }
 0x273   : > { %v719_v27 = vsel %vm718_vm7, %v715_v22, %v717_v26 }
 0x274   : > { %721 = vst [vmem:[%s1231_s28 + $0x1c8] sm:$0xff] %v719_v27 }
 0x276   : > { %v731_v41 = vpop.permute.xlu0 %730  ;;  %v725_v42 = vpop.permute.xlu1 %724 }
 0x277   : > { %v727_v28 = vsel %vm726_vm8, %v723_v25, %v725_v42 }
 0x278   : > { %729 = vst [vmem:[%s1231_s28 + $0x1d0] sm:$0xff] %v727_v28 }
 0x27a   : > { %v739_v29 = vpop.permute.xlu0 %738  ;;  %v733_v30 = vpop.permute.xlu1 %732 }
 0x27b   : > { %v735_v31 = vsel %vm734_vm9, %v731_v41, %v733_v30 }
 0x27c   : > { %737 = vst [vmem:[%s1231_s28 + $0x1d8] sm:$0xff] %v735_v31 }
 0x27e   : > { %v747_v32 = vpop.permute.xlu0 %746  ;;  %v741_v33 = vpop.permute.xlu1 %740 }
 0x27f   : > { %v743_v34 = vsel %vm742_vm10, %v739_v29, %v741_v33 }
 0x280   : > { %745 = vst [vmem:[%s1231_s28 + $0x1e0] sm:$0xff] %v743_v34 }
 0x282   : > { %v749_v35 = vpop.permute.xlu1 %748  ;;  %v261_v36 = vpop.permute.xlu0 %260 }
 0x283   : > { %v751_v37 = vsel %vm750_vm11, %v747_v32, %v749_v35  ;;  %v263_v38 = vsel %vm262_vm12, %v1296_v44, %v261_v36 }
 0x284   : > { %753 = vst [vmem:[%s1231_s28 + $0x1e8] sm:$0xff] %v751_v37  ;;  %265 = vst [vmem:[%s1231_s28] sm:$0xff] %v263_v38 }
 0x286   : > { %v757_v39 = vpop.permute.xlu1 %756  ;;  %v755_v40 = vpop.permute.xlu0 %754 }
 0x287   : > { %v759_v43 = vsel %vm758_vm13, %v755_v40, %v757_v39 }
 0x288   : > { %761 = vst [vmem:[%s1231_s28 + $0x1f0] sm:$0xff] %v759_v43 }
 0x289   : > { %1029 = shalt.err (!%p1026_p13)
}
 0x28a   : > { %s1030_s28 = scalar_lea.hbm %s1435_s24, 8192  ;;  %s1034_s4 = scalar_lea.hbm %s1474_s1, 32768 }
 0x28b   : > { %p1031_p0 = scmp.ne.s32.totalorder %s1435_s24, %s1030_s28  ;;  %p1035_p3 = scmp.lt.s32.totalorder %s1435_s24, %s1474_s1 }
 0x28c   : > { %p1036_p4 = scmp.lt.s32.totalorder %s1034_s4, %s1030_s28 }
 0x28d   : > { %p1032_p1 = pnand %p1031_p0, %p1197_p5 }
 0x28e   : > { %p1037_p7 = por %p1036_p4, %p1035_p3 }
 0x28f   : > { %p1033_p2 = pneg %p1032_p1 }
 0x291   : > { %p1038_p6 = pnand %p1037_p7, %p1033_p2 }
 0x293   : > { %1041 = shalt.err (!%p1038_p6)
}
 0x294   : > { %875 = dma.vmem_to_hbm [thread:$0]  (%p1197_p5), %s779_s21, 8192, %s1435_s24, %s764_s25  }
 0x295 PF: > { %p887_p8 = scmp.ge.s32.totalorder %s1080_s9, 2  ;;  %s790_s13 = sand.u32 1, %s1068_s6  }
 0x296   : > { %p1478_p9 = scmp.ne.s32.totalorder %s1476_s17, 0  ;;  %s791_s14 = scalar_lea.sflag [#allocation4], %s790_s13 }
 0x298   : > { %p882_p10 = pnand %p887_p8, %p1478_p9 }
 0x29a   : > { %p883_p11 = pneg %p882_p10 }
 0x29c   : > { %1063 = dma.done.wait (%p883_p11), %s791_s14, 8192  }
 0x29d   : > { %1065 = vsyncadd (%p883_p11), %s791_s14, 4294959104  ;;  %p12_p12 = scmp.ge.s32.totalorder %s1184_s12, 6   ;;  %s1479_s6 = smov %s1072_s7 }
 0x29e   : > { %s1480_s7 = smov %s1076_s8  ;;  %s1481_s8 = smov %s1195_s15 }
 0x29f   : > { %s1482_s9 = smov %s1184_s12  ;;  %14 = sbr.rel (!%p12_p12) target bundleno = 4 (0x4), region = 61 }
 0x2a4   :  { %796 = vsyncpa [#allocation3], 1 }
 0x2a5   :  { %798 = vsyncpa [#allocation3 + $0x1], 1 }
 0x2a6   :  { %799 = vsyncpa [#allocation4], 1 }
 0x2a7   :  { %801 = vsyncpa [#allocation4 + $0x1], 1 }

</bundles_post_ra>
